<compile_context>
chip_gen: v5e
topology: v5e:2x2
jax: 0.10.0
libtpu: 0.0.40
codegen_flags: <defaults>
</compile_context>

<pallas_src>
import functools

import numpy as np
import jax
import jax.numpy as jnp
from jax.experimental import pallas as pl
from jax.experimental.pallas import tpu as pltpu


# --------------------------------------------------------------------------
# Pallas kernel: one (batch block, WN layer) grid step
# --------------------------------------------------------------------------
def posterior_encoder_kernel(
    lens_ref, dil_ref,                          # SMEM scalar prefetch: (B,), (L,)
    x_ref, noise_ref,                           # (bblk,T,Cin), (bblk,T,Cp)
    pre_w_ref, pre_b_ref,                       # (Cin,H) bf16, (1,H) f32
    in_wt_ref, in_ws_ref,                       # (L*K,H,H) bf16 each (resident)
    in_bt_ref, in_bs_ref,                       # (L,1,H) f32 each (resident)
    res_w_ref, res_b_ref,                       # (L,H,H) bf16, (L,1,H) f32
    skip_w_ref, skip_b_ref,                     # (L,H,H) bf16, (L,1,H) f32
    projm_w_ref, projm_b_ref,                   # (H,Cp) bf16, (1,Cp) f32
    projs_w_ref, projs_b_ref,                   # (H,Cp) bf16, (1,Cp) f32
    z_ref, m_ref, logs_ref,                     # outputs: (bblk,T,Cp) each
    h_pad_ref, skip_ref, mask_ref,              # VMEM scratch
    *, hidden, kernel_size, pad, bblk,
):
    f32 = jnp.float32
    bf16 = jnp.bfloat16
    b = pl.program_id(0)
    l = pl.program_id(1)
    n_layers = pl.num_programs(1)
    T = x_ref.shape[1]
    H = hidden
    K = kernel_size
    P = pad
    center = (K - 1) // 2

    # ---- first layer: mask + pre 1x1 conv + scratch init -------------------
    @pl.when(l == 0)
    def _init():
        t_idx = jax.lax.broadcasted_iota(jnp.int32, (T, 1), 0)
        zero_halo = jnp.zeros((P, H), f32)
        for i in range(bblk):
            length = lens_ref[b * bblk + i]
            mask_i = (t_idx < length).astype(f32)                      # (T,1)
            mask_ref[pl.ds(i * T, T), :] = mask_i
            h0 = (jnp.dot(x_ref[i].astype(bf16), pre_w_ref[...],
                          preferred_element_type=f32)
                  + pre_b_ref[...]) * mask_i                           # (T,H)
            # only zero the two halo strips; interior is overwritten with h0
            h_pad_ref[i, pl.ds(0, P), :] = zero_halo
            h_pad_ref[i, pl.ds(P + T, P), :] = zero_halo
            h_pad_ref[i, pl.ds(P, T), :] = h0
        skip_ref[...] = jnp.zeros_like(skip_ref)

    mask = mask_ref[...]                                               # (bblk*T,1)

    # ---- dilated "same" conv for the current layer --------------------------
    d = dil_ref[l]                                                     # dilation

    def tap(k):                                  # h shifted by d*(k-center)
        start = P + d * (k - center)             # always >= 0 (P >= d_max*center)
        parts = [h_pad_ref[i, pl.ds(start, T), :] for i in range(bblk)]
        return parts[0] if bblk == 1 else jnp.concatenate(parts, axis=0)

    h_center = None
    acc_t = None
    acc_s = None
    for k in range(K):
        hk = tap(k)                                                    # (bblk*T,H) f32
        if k == center:
            h_center = hk                        # reuse for residual update
        hkb = hk.astype(bf16)
        w_idx = l * K + k
        pt = jnp.dot(hkb, in_wt_ref[w_idx], preferred_element_type=f32)
        ps = jnp.dot(hkb, in_ws_ref[w_idx], preferred_element_type=f32)
        acc_t = pt if acc_t is None else acc_t + pt
        acc_s = ps if acc_s is None else acc_s + ps

    # fused_add_tanh_sigmoid_multiply (dropout p=0 in PosteriorEncoder)
    acts = jnp.tanh(acc_t + in_bt_ref[l]) * jax.nn.sigmoid(acc_s + in_bs_ref[l])
    acts_b = acts.astype(bf16)

    # 1x1 residual conv + residual update (skipped on the last layer,
    # whose res half is structurally absent / zero in WN)
    @pl.when(l != n_layers - 1)
    def _residual():
        res = (jnp.dot(acts_b, res_w_ref[l], preferred_element_type=f32)
               + res_b_ref[l])
        h_new = (h_center + res) * mask                                # (bblk*T,H)
        for i in range(bblk):
            h_pad_ref[i, pl.ds(P, T), :] = h_new[i * T:(i + 1) * T]

    # 1x1 skip conv + skip accumulation
    skip_ref[...] = (skip_ref[...]
                     + jnp.dot(acts_b, skip_w_ref[l], preferred_element_type=f32)
                     + skip_b_ref[l])

    # ---- last layer: proj 1x1 conv, split into (m, logs), sample z ----------
    @pl.when(l == n_layers - 1)
    def _finalize():
        s = (skip_ref[...] * mask).astype(bf16)
        m = (jnp.dot(s, projm_w_ref[...], preferred_element_type=f32)
             + projm_b_ref[...]) * mask
        logs = (jnp.dot(s, projs_w_ref[...], preferred_element_type=f32)
                + projs_b_ref[...]) * mask
        for i in range(bblk):
            m_i = m[i * T:(i + 1) * T]
            logs_i = logs[i * T:(i + 1) * T]
            mask_i = mask[i * T:(i + 1) * T]
            z_i = (m_i + noise_ref[i] * jnp.exp(logs_i)) * mask_i
            z_ref[i] = z_i
            m_ref[i] = m_i
            logs_ref[i] = logs_i


# --------------------------------------------------------------------------
# Wrapper
# --------------------------------------------------------------------------
def posterior_encoder(x, x_lengths, noise, params, *,
                      hidden, out_ch, n_layers, kernel_size, dilation_rate,
                      bblk=None):
    B, T, Cin = x.shape
    H, Co, L, K = hidden, out_ch, n_layers, kernel_size
    if bblk is None:
        bblk = 2 if B % 2 == 0 else 1
    assert B % bblk == 0, "batch must be divisible by the batch block"

    center = (K - 1) // 2
    max_d = dilation_rate ** (L - 1)
    # 8-aligned halo (sublane-aligned center tap).
    # TODO(synk): for dilation_rate>1 and large L this max-dilation halo grows
    # exponentially; switch to per-tap validity masking if VMEM becomes tight.
    pad = max(8, ((max_d * center + 7) // 8) * 8)
    Cp = ((Co + 127) // 128) * 128                      # lane-dense output width

    dil = jnp.asarray([dilation_rate ** i for i in range(L)], dtype=jnp.int32)

    # ---- weight prep: bf16 cast, flatten layer*tap, pad proj columns -------
    bf16 = jnp.bfloat16
    pre_w = params["pre_w"].astype(bf16)
    in_w_t = params["in_w_t"].reshape(L * K, H, H).astype(bf16)
    in_w_s = params["in_w_s"].reshape(L * K, H, H).astype(bf16)
    res_w = params["res_w"].astype(bf16)
    skip_w = params["skip_w"].astype(bf16)
    proj_w_m = jnp.pad(params["proj_w_m"], ((0, 0), (0, Cp - Co))).astype(bf16)
    proj_w_s = jnp.pad(params["proj_w_s"], ((0, 0), (0, Cp - Co))).astype(bf16)
    proj_b_m = jnp.pad(params["proj_b_m"], ((0, 0), (0, Cp - Co)))
    proj_b_s = jnp.pad(params["proj_b_s"], ((0, 0), (0, Cp - Co)))
    noise_p = jnp.pad(noise, ((0, 0), (0, 0), (0, Cp - Co)))

    kernel = functools.partial(
        posterior_encoder_kernel,
        hidden=H, kernel_size=K, pad=pad, bblk=bblk,
    )

    grid_spec = pltpu.PrefetchScalarGridSpec(
        num_scalar_prefetch=2,                 # x_lengths, per-layer dilations
        grid=(B // bblk, L),                   # batch blocks (parallel) x layers
        in_specs=[
            pl.BlockSpec((bblk, T, Cin), lambda bb, l, lens, dil: (bb, 0, 0)),   # x
            pl.BlockSpec((bblk, T, Cp), lambda bb, l, lens, dil: (bb, 0, 0)),    # noise
            pl.BlockSpec((Cin, H), lambda bb, l, lens, dil: (0, 0)),             # pre_w
            pl.BlockSpec((1, H), lambda bb, l, lens, dil: (0, 0)),               # pre_b
            # Whole-stack resident weights (constant index -> DMA'd once):
            pl.BlockSpec((L * K, H, H), lambda bb, l, lens, dil: (0, 0, 0)),     # in_w_t
            pl.BlockSpec((L * K, H, H), lambda bb, l, lens, dil: (0, 0, 0)),     # in_w_s
            pl.BlockSpec((L, 1, H), lambda bb, l, lens, dil: (0, 0, 0)),         # in_b_t
            pl.BlockSpec((L, 1, H), lambda bb, l, lens, dil: (0, 0, 0)),         # in_b_s
            pl.BlockSpec((L, H, H), lambda bb, l, lens, dil: (0, 0, 0)),         # res_w
            pl.BlockSpec((L, 1, H), lambda bb, l, lens, dil: (0, 0, 0)),         # res_b
            pl.BlockSpec((L, H, H), lambda bb, l, lens, dil: (0, 0, 0)),         # skip_w
            pl.BlockSpec((L, 1, H), lambda bb, l, lens, dil: (0, 0, 0)),         # skip_b
            pl.BlockSpec((H, Cp), lambda bb, l, lens, dil: (0, 0)),              # proj_w_m
            pl.BlockSpec((1, Cp), lambda bb, l, lens, dil: (0, 0)),              # proj_b_m
            pl.BlockSpec((H, Cp), lambda bb, l, lens, dil: (0, 0)),              # proj_w_s
            pl.BlockSpec((1, Cp), lambda bb, l, lens, dil: (0, 0)),              # proj_b_s
        ],
        out_specs=[
            pl.BlockSpec((bblk, T, Cp), lambda bb, l, lens, dil: (bb, 0, 0)),    # z
            pl.BlockSpec((bblk, T, Cp), lambda bb, l, lens, dil: (bb, 0, 0)),    # m
            pl.BlockSpec((bblk, T, Cp), lambda bb, l, lens, dil: (bb, 0, 0)),    # logs
        ],
        scratch_shapes=[
            pltpu.VMEM((bblk, T + 2 * pad, H), jnp.float32),   # h with zero halo
            pltpu.VMEM((bblk * T, H), jnp.float32),            # skip accumulator
            pltpu.VMEM((bblk * T, 1), jnp.float32),            # sequence mask
        ],
    )

    out_shape = (
        jax.ShapeDtypeStruct((B, T, Cp), jnp.float32),
        jax.ShapeDtypeStruct((B, T, Cp), jnp.float32),
        jax.ShapeDtypeStruct((B, T, Cp), jnp.float32),
    )

    z, m, logs = pl.pallas_call(
        kernel,
        out_shape=out_shape,
        grid_spec=grid_spec,
        compiler_params=pltpu.CompilerParams(
            dimension_semantics=("parallel", "arbitrary"),
            vmem_limit_bytes=48 * 1024 * 1024),
    )(x_lengths, dil, x, noise_p,
      pre_w, params["pre_b"],
      in_w_t, in_w_s, params["in_b_t"], params["in_b_s"],
      res_w, params["res_b"], skip_w, params["skip_b"],
      proj_w_m, proj_b_m, proj_w_s, proj_b_s)

    # Strip the lane-padding back to the logical output channel count.
    z, m, logs = z[:, :, :Co], m[:, :, :Co], logs[:, :, :Co]

    # x_mask computed in the wrapper (no masked (T,1) kernel output).
    x_mask = (jnp.arange(T)[None, :] < x_lengths[:, None]).astype(x.dtype)[:, :, None]
    return z, m, logs, x_mask


# --------------------------------------------------------------------------
# Synthetic weights (pre-split into tanh/sigmoid and res/skip halves)
# --------------------------------------------------------------------------
def init_params(key, Cin, Cout, H, K, L):
    ks = jax.random.split(key, 14)

    def rnd(k, shape, scale):
        return scale * jax.random.normal(k, shape, jnp.float32)

    p = {}
    p["pre_w"] = rnd(ks[0], (Cin, H), 1.0 / np.sqrt(Cin))
    p["pre_b"] = rnd(ks[1], (1, H), 0.01)
    p["in_w_t"] = rnd(ks[2], (L, K, H, H), 1.0 / np.sqrt(H * K))
    p["in_w_s"] = rnd(ks[3], (L, K, H, H), 1.0 / np.sqrt(H * K))
    p["in_b_t"] = rnd(ks[4], (L, 1, H), 0.01)
    p["in_b_s"] = rnd(ks[5], (L, 1, H), 0.01)
    res_w = rnd(ks[6], (L, H, H), 1.0 / np.sqrt(H))
    res_b = rnd(ks[7], (L, 1, H), 0.01)
    # Last WN layer's res_skip conv is skip-only: zero the residual half.
    res_w = res_w.at[L - 1].set(0.0)
    res_b = res_b.at[L - 1].set(0.0)
    p["res_w"], p["res_b"] = res_w, res_b
    p["skip_w"] = rnd(ks[8], (L, H, H), 1.0 / np.sqrt(H))
    p["skip_b"] = rnd(ks[9], (L, 1, H), 0.01)
    p["proj_w_m"] = rnd(ks[10], (H, Cout), 1.0 / np.sqrt(H))
    p["proj_b_m"] = rnd(ks[11], (1, Cout), 0.01)
    p["proj_w_s"] = rnd(ks[12], (H, Cout), 1.0 / np.sqrt(H))
    p["proj_b_s"] = rnd(ks[13], (1, Cout), 0.01)
    return p


# --------------------------------------------------------------------------
# Pure-JAX reference (same structure; mirrors the bf16-matmul / f32-accumulate
# numerics of the kernel) for validation
# --------------------------------------------------------------------------
def reference_forward(x, x_lengths, noise, params, *,
                      hidden, out_ch, n_layers, kernel_size, dilation_rate):
    f32 = jnp.float32
    bf16 = jnp.bfloat16
    B, T, _ = x.shape
    H = hidden

    def mm(a, w):   # bf16 inputs, f32 accumulation (matches the MXU path)
        return jnp.einsum("bti,io->bto", a.astype(bf16), w.astype(bf16),
                          preferred_element_type=f32)

    mask = (jnp.arange(T)[None, :] < x_lengths[:, None]).astype(f32)[:, :, None]
    h = (mm(x, params["pre_w"]) + params["pre_b"][0]) * mask
    skip = jnp.zeros((B, T, H), f32)
    center = (kernel_size - 1) // 2
    for i in range(n_layers):
        d = dilation_rate ** i
        p = d * center
        h_p = jnp.pad(h, ((0, 0), (p, p), (0, 0)))
        acc_t = jnp.zeros((B, T, H), f32)
        acc_s = jnp.zeros((B, T, H), f32)
        for k in range(kernel_size):
            hs = h_p[:, d * k: d * k + T, :]
            acc_t = acc_t + mm(hs, params["in_w_t"][i, k])
            acc_s = acc_s + mm(hs, params["in_w_s"][i, k])
        acts = (jnp.tanh(acc_t + params["in_b_t"][i, 0])
                * jax.nn.sigmoid(acc_s + params["in_b_s"][i, 0]))
        if i < n_layers - 1:     # last layer is skip-only in WN
            res = mm(acts, params["res_w"][i]) + params["res_b"][i, 0]
            h = (h + res) * mask
        skip = skip + mm(acts, params["skip_w"][i]) + params["skip_b"][i, 0]
    skip = skip * mask
    m = (mm(skip, params["proj_w_m"]) + params["proj_b_m"][0]) * mask
    logs = (mm(skip, params["proj_w_s"]) + params["proj_b_s"][0]) * mask
    z = (m + noise * jnp.exp(logs)) * mask
    return z, m, logs, mask


# --------------------------------------------------------------------------
if __name__ == "__main__":
    # Small, deterministic config
    B, T = 2, 16
    in_channels, out_channels, hidden_channels = 8, 4, 32
    kernel_size, dilation_rate, n_layers = 5, 2, 3

    key = jax.random.PRNGKey(0)
    k_x, k_n, k_p = jax.random.split(key, 3)

    x = jax.random.normal(k_x, (B, T, in_channels), jnp.float32)   # channels-last
    x_lengths = jnp.array([16, 11], dtype=jnp.int32)
    # torch.randn_like(m) replaced by an explicit noise input (deterministic).
    noise = jax.random.normal(k_n, (B, T, out_channels), jnp.float32)

    params = init_params(k_p, in_channels, out_channels, hidden_channels,
                         kernel_size, n_layers)

    z, m, logs, x_mask = posterior_encoder(
        x, x_lengths, noise, params,
        hidden=hidden_channels, out_ch=out_channels, n_layers=n_layers,
        kernel_size=kernel_size, dilation_rate=dilation_rate, bblk=2)
    jax.block_until_ready((z, m, logs, x_mask))

    z_r, m_r, logs_r, mask_r = reference_forward(
        x, x_lengths, noise, params,
        hidden=hidden_channels, out_ch=out_channels, n_layers=n_layers,
        kernel_size=kernel_size, dilation_rate=dilation_rate)

    np.testing.assert_allclose(np.asarray(z), np.asarray(z_r), rtol=2e-2, atol=2e-2)
    np.testing.assert_allclose(np.asarray(m), np.asarray(m_r), rtol=2e-2, atol=2e-2)
    np.testing.assert_allclose(np.asarray(logs), np.asarray(logs_r), rtol=2e-2, atol=2e-2)
    np.testing.assert_allclose(np.asarray(x_mask), np.asarray(mask_r), rtol=0, atol=0)

    print("KERNEL_OK")
</pallas_src>

<mosaic_0001>
module attributes {stable_mosaic.version = 11 : i64} {
  func.func @posterior_encoder_kernel(%arg0: i32, %arg1: i32, %arg2: memref<2xi32, #tpu.memory_space<smem>>, %arg3: memref<3xi32, #tpu.memory_space<smem>>, %arg4: memref<2x16x8xf32, #tpu.memory_space<vmem>>, %arg5: memref<2x16x128xf32, #tpu.memory_space<vmem>>, %arg6: memref<8x32xbf16, #tpu.memory_space<vmem>>, %arg7: memref<1x32xf32, #tpu.memory_space<vmem>>, %arg8: memref<15x32x32xbf16, #tpu.memory_space<vmem>>, %arg9: memref<15x32x32xbf16, #tpu.memory_space<vmem>>, %arg10: memref<3x1x32xf32, #tpu.memory_space<vmem>>, %arg11: memref<3x1x32xf32, #tpu.memory_space<vmem>>, %arg12: memref<3x32x32xbf16, #tpu.memory_space<vmem>>, %arg13: memref<3x1x32xf32, #tpu.memory_space<vmem>>, %arg14: memref<3x32x32xbf16, #tpu.memory_space<vmem>>, %arg15: memref<3x1x32xf32, #tpu.memory_space<vmem>>, %arg16: memref<32x128xbf16, #tpu.memory_space<vmem>>, %arg17: memref<1x128xf32, #tpu.memory_space<vmem>>, %arg18: memref<32x128xbf16, #tpu.memory_space<vmem>>, %arg19: memref<1x128xf32, #tpu.memory_space<vmem>>, %arg20: memref<2x16x128xf32, #tpu.memory_space<vmem>>, %arg21: memref<2x16x128xf32, #tpu.memory_space<vmem>>, %arg22: memref<2x16x128xf32, #tpu.memory_space<vmem>>, %arg23: memref<2x32x32xf32, #tpu.memory_space<vmem>>, %arg24: memref<32x32xf32, #tpu.memory_space<vmem>>, %arg25: memref<32x1xf32, #tpu.memory_space<vmem>>) attributes {dimension_semantics = [#tpu.dimension_semantics<parallel>, #tpu.dimension_semantics<arbitrary>], iteration_bounds = array<i64: 1, 3>, scalar_prefetch = 2 : i64, scratch_operands = 3 : i64, tpu.core_type = #tpu.core_type<tc>, window_params = [{transform_indices = @transform_0, window_bounds = array<i64: 2, 16, 8>}, {transform_indices = @transform_1, window_bounds = array<i64: 2, 16, 128>}, {pipeline_mode = #tpu.pipeline_mode<synchronous>, transform_indices = @transform_2, window_bounds = array<i64: 8, 32>}, {pipeline_mode = #tpu.pipeline_mode<synchronous>, transform_indices = @transform_3, window_bounds = array<i64: 1, 32>}, {pipeline_mode = #tpu.pipeline_mode<synchronous>, transform_indices = @transform_4, window_bounds = array<i64: 15, 32, 32>}, {pipeline_mode = #tpu.pipeline_mode<synchronous>, transform_indices = @transform_5, window_bounds = array<i64: 15, 32, 32>}, {pipeline_mode = #tpu.pipeline_mode<synchronous>, transform_indices = @transform_6, window_bounds = array<i64: 3, 1, 32>}, {pipeline_mode = #tpu.pipeline_mode<synchronous>, transform_indices = @transform_7, window_bounds = array<i64: 3, 1, 32>}, {pipeline_mode = #tpu.pipeline_mode<synchronous>, transform_indices = @transform_8, window_bounds = array<i64: 3, 32, 32>}, {pipeline_mode = #tpu.pipeline_mode<synchronous>, transform_indices = @transform_9, window_bounds = array<i64: 3, 1, 32>}, {pipeline_mode = #tpu.pipeline_mode<synchronous>, transform_indices = @transform_10, window_bounds = array<i64: 3, 32, 32>}, {pipeline_mode = #tpu.pipeline_mode<synchronous>, transform_indices = @transform_11, window_bounds = array<i64: 3, 1, 32>}, {pipeline_mode = #tpu.pipeline_mode<synchronous>, transform_indices = @transform_12, window_bounds = array<i64: 32, 128>}, {pipeline_mode = #tpu.pipeline_mode<synchronous>, transform_indices = @transform_13, window_bounds = array<i64: 1, 128>}, {pipeline_mode = #tpu.pipeline_mode<synchronous>, transform_indices = @transform_14, window_bounds = array<i64: 32, 128>}, {pipeline_mode = #tpu.pipeline_mode<synchronous>, transform_indices = @transform_15, window_bounds = array<i64: 1, 128>}, {transform_indices = @transform_16, window_bounds = array<i64: 2, 16, 128>}, {transform_indices = @transform_17, window_bounds = array<i64: 2, 16, 128>}, {transform_indices = @transform_18, window_bounds = array<i64: 2, 16, 128>}]} {
    %c0_i32 = arith.constant 0 : i32
    %0 = arith.cmpi eq, %arg1, %c0_i32 : i32
    %1 = arith.extui %0 : i1 to i32
    %c0_i32_0 = arith.constant 0 : i32
    %2 = arith.cmpi ne, %1, %c0_i32_0 : i32
    scf.if %2 {
      %150 = tpu.iota {dimensions = array<i32: 0>} : vector<16x1xi32>
      %cst_80 = arith.constant 0.000000e+00 : f32
      %151 = vector.broadcast %cst_80 : f32 to vector<8x32xf32>
      %c2_i32_81 = arith.constant 2 : i32
      %152 = arith.muli %arg0, %c2_i32_81 : i32
      %c0_i32_82 = arith.constant 0 : i32
      %153 = arith.addi %152, %c0_i32_82 : i32
      %154 = arith.index_cast %153 : i32 to index
      %155 = memref.load %arg2[%154] : memref<2xi32, #tpu.memory_space<smem>>
      %156 = vector.broadcast %155 : i32 to vector<16x1xi32>
      %157 = arith.cmpi slt, %150, %156 : vector<16x1xi32>
      %158 = arith.extui %157 : vector<16x1xi1> to vector<16x1xi32>
      %159 = arith.sitofp %158 : vector<16x1xi32> to vector<16x1xf32>
      %c0_83 = arith.constant 0 : index
      %c0_84 = arith.constant 0 : index
      %160 = vector.load %arg25[%c0_83, %c0_84] : memref<32x1xf32, #tpu.memory_space<vmem>>, vector<16x1xf32>
      tpu.vector_store %arg25[%c0_83, %c0_84], %159 {strides = array<i32>} : memref<32x1xf32, #tpu.memory_space<vmem>>, vector<16x1xf32>,
      %c0_85 = arith.constant 0 : index
      %c0_86 = arith.constant 0 : index
      %c0_87 = arith.constant 0 : index
      %161 = vector.load %arg4[%c0_85, %c0_86, %c0_87] : memref<2x16x8xf32, #tpu.memory_space<vmem>>, vector<1x16x8xf32>
      %162 = vector.shape_cast %161 : vector<1x16x8xf32> to vector<16x8xf32>
      %163 = arith.truncf %162 : vector<16x8xf32> to vector<16x8xbf16>
      %c0_88 = arith.constant 0 : index
      %c0_89 = arith.constant 0 : index
      %164 = vector.load %arg6[%c0_88, %c0_89] : memref<8x32xbf16, #tpu.memory_space<vmem>>, vector<8x32xbf16>
      %cst_90 = arith.constant dense<0.000000e+00> : vector<16x32xf32>
      %165 = tpu.matmul %163, %164, %cst_90 {dimension_numbers = #tpu.dot_dimension_numbers<[1], [0], [0], [1], [0, 0, 1, 1], [], []>} : vector<16x8xbf16>, vector<8x32xbf16>, vector<16x32xf32> -> vector<16x32xf32>
      %c0_91 = arith.constant 0 : index
      %c0_92 = arith.constant 0 : index
      %166 = vector.load %arg7[%c0_91, %c0_92] : memref<1x32xf32, #tpu.memory_space<vmem>>, vector<1x32xf32>
      %167 = vector.broadcast %166 : vector<1x32xf32> to vector<16x32xf32>
      %168 = arith.addf %165, %167 : vector<16x32xf32>
      %169 = vector.broadcast %159 : vector<16x1xf32> to vector<16x32xf32>
      %170 = arith.mulf %168, %169 : vector<16x32xf32>
      %c0_93 = arith.constant 0 : index
      %c0_94 = arith.constant 0 : index
      %c0_95 = arith.constant 0 : index
      %171 = vector.load %arg23[%c0_93, %c0_94, %c0_95] : memref<2x32x32xf32, #tpu.memory_space<vmem>>, vector<1x8x32xf32>
      %172 = vector.shape_cast %171 : vector<1x8x32xf32> to vector<8x32xf32>
      %173 = vector.shape_cast %151 : vector<8x32xf32> to vector<1x8x32xf32>
      tpu.vector_store %arg23[%c0_93, %c0_94, %c0_95], %173 {strides = array<i32>} : memref<2x32x32xf32, #tpu.memory_space<vmem>>, vector<1x8x32xf32>,
      %c0_96 = arith.constant 0 : index
      %c24 = arith.constant 24 : index
      %c0_97 = arith.constant 0 : index
      %174 = vector.load %arg23[%c0_96, %c24, %c0_97] : memref<2x32x32xf32, #tpu.memory_space<vmem>>, vector<1x8x32xf32>
      %175 = vector.shape_cast %174 : vector<1x8x32xf32> to vector<8x32xf32>
      %176 = vector.shape_cast %151 : vector<8x32xf32> to vector<1x8x32xf32>
      tpu.vector_store %arg23[%c0_96, %c24, %c0_97], %176 {strides = array<i32>} : memref<2x32x32xf32, #tpu.memory_space<vmem>>, vector<1x8x32xf32>,
      %c0_98 = arith.constant 0 : index
      %c8 = arith.constant 8 : index
      %c0_99 = arith.constant 0 : index
      %177 = vector.load %arg23[%c0_98, %c8, %c0_99] : memref<2x32x32xf32, #tpu.memory_space<vmem>>, vector<1x16x32xf32>
      %178 = vector.shape_cast %177 : vector<1x16x32xf32> to vector<16x32xf32>
      %179 = vector.shape_cast %170 : vector<16x32xf32> to vector<1x16x32xf32>
      tpu.vector_store %arg23[%c0_98, %c8, %c0_99], %179 {strides = array<i32>} : memref<2x32x32xf32, #tpu.memory_space<vmem>>, vector<1x16x32xf32>,
      %c2_i32_100 = arith.constant 2 : i32
      %180 = arith.muli %arg0, %c2_i32_100 : i32
      %c1_i32_101 = arith.constant 1 : i32
      %181 = arith.addi %180, %c1_i32_101 : i32
      %182 = arith.index_cast %181 : i32 to index
      %183 = memref.load %arg2[%182] : memref<2xi32, #tpu.memory_space<smem>>
      %184 = vector.broadcast %183 : i32 to vector<16x1xi32>
      %185 = arith.cmpi slt, %150, %184 : vector<16x1xi32>
      %186 = arith.extui %185 : vector<16x1xi1> to vector<16x1xi32>
      %187 = arith.sitofp %186 : vector<16x1xi32> to vector<16x1xf32>
      %c16 = arith.constant 16 : index
      %c0_102 = arith.constant 0 : index
      %188 = vector.load %arg25[%c16, %c0_102] : memref<32x1xf32, #tpu.memory_space<vmem>>, vector<16x1xf32>
      tpu.vector_store %arg25[%c16, %c0_102], %187 {strides = array<i32>} : memref<32x1xf32, #tpu.memory_space<vmem>>, vector<16x1xf32>,
      %c1_103 = arith.constant 1 : index
      %c0_104 = arith.constant 0 : index
      %c0_105 = arith.constant 0 : index
      %189 = vector.load %arg4[%c1_103, %c0_104, %c0_105] : memref<2x16x8xf32, #tpu.memory_space<vmem>>, vector<1x16x8xf32>
      %190 = vector.shape_cast %189 : vector<1x16x8xf32> to vector<16x8xf32>
      %191 = arith.truncf %190 : vector<16x8xf32> to vector<16x8xbf16>
      %c0_106 = arith.constant 0 : index
      %c0_107 = arith.constant 0 : index
      %192 = vector.load %arg6[%c0_106, %c0_107] : memref<8x32xbf16, #tpu.memory_space<vmem>>, vector<8x32xbf16>
      %cst_108 = arith.constant dense<0.000000e+00> : vector<16x32xf32>
      %193 = tpu.matmul %191, %192, %cst_108 {dimension_numbers = #tpu.dot_dimension_numbers<[1], [0], [0], [1], [0, 0, 1, 1], [], []>} : vector<16x8xbf16>, vector<8x32xbf16>, vector<16x32xf32> -> vector<16x32xf32>
      %c0_109 = arith.constant 0 : index
      %c0_110 = arith.constant 0 : index
      %194 = vector.load %arg7[%c0_109, %c0_110] : memref<1x32xf32, #tpu.memory_space<vmem>>, vector<1x32xf32>
      %195 = vector.broadcast %194 : vector<1x32xf32> to vector<16x32xf32>
      %196 = arith.addf %193, %195 : vector<16x32xf32>
      %197 = vector.broadcast %187 : vector<16x1xf32> to vector<16x32xf32>
      %198 = arith.mulf %196, %197 : vector<16x32xf32>
      %c1_111 = arith.constant 1 : index
      %c0_112 = arith.constant 0 : index
      %c0_113 = arith.constant 0 : index
      %199 = vector.load %arg23[%c1_111, %c0_112, %c0_113] : memref<2x32x32xf32, #tpu.memory_space<vmem>>, vector<1x8x32xf32>
      %200 = vector.shape_cast %199 : vector<1x8x32xf32> to vector<8x32xf32>
      %201 = vector.shape_cast %151 : vector<8x32xf32> to vector<1x8x32xf32>
      tpu.vector_store %arg23[%c1_111, %c0_112, %c0_113], %201 {strides = array<i32>} : memref<2x32x32xf32, #tpu.memory_space<vmem>>, vector<1x8x32xf32>,
      %c1_114 = arith.constant 1 : index
      %c24_115 = arith.constant 24 : index
      %c0_116 = arith.constant 0 : index
      %202 = vector.load %arg23[%c1_114, %c24_115, %c0_116] : memref<2x32x32xf32, #tpu.memory_space<vmem>>, vector<1x8x32xf32>
      %203 = vector.shape_cast %202 : vector<1x8x32xf32> to vector<8x32xf32>
      %204 = vector.shape_cast %151 : vector<8x32xf32> to vector<1x8x32xf32>
      tpu.vector_store %arg23[%c1_114, %c24_115, %c0_116], %204 {strides = array<i32>} : memref<2x32x32xf32, #tpu.memory_space<vmem>>, vector<1x8x32xf32>,
      %c1_117 = arith.constant 1 : index
      %c8_118 = arith.constant 8 : index
      %c0_119 = arith.constant 0 : index
      %205 = vector.load %arg23[%c1_117, %c8_118, %c0_119] : memref<2x32x32xf32, #tpu.memory_space<vmem>>, vector<1x16x32xf32>
      %206 = vector.shape_cast %205 : vector<1x16x32xf32> to vector<16x32xf32>
      %207 = vector.shape_cast %198 : vector<16x32xf32> to vector<1x16x32xf32>
      tpu.vector_store %arg23[%c1_117, %c8_118, %c0_119], %207 {strides = array<i32>} : memref<2x32x32xf32, #tpu.memory_space<vmem>>, vector<1x16x32xf32>,
      %cst_120 = arith.constant 0.000000e+00 : f32
      %208 = vector.broadcast %cst_120 : f32 to vector<32x32xf32>
      %c0_121 = arith.constant 0 : index
      %c0_122 = arith.constant 0 : index
      %209 = vector.load %arg24[%c0_121, %c0_122] : memref<32x32xf32, #tpu.memory_space<vmem>>, vector<32x32xf32>
      tpu.vector_store %arg24[%c0_121, %c0_122], %208 {strides = array<i32>} : memref<32x32xf32, #tpu.memory_space<vmem>>, vector<32x32xf32>,
    } else {
    }
    %c0 = arith.constant 0 : index
    %c0_1 = arith.constant 0 : index
    %3 = vector.load %arg25[%c0, %c0_1] : memref<32x1xf32, #tpu.memory_space<vmem>>, vector<32x1xf32>
    %4 = arith.index_cast %arg1 : i32 to index
    %5 = memref.load %arg3[%4] : memref<3xi32, #tpu.memory_space<smem>>
    %c-2_i32 = arith.constant -2 : i32
    %6 = arith.muli %5, %c-2_i32 : i32
    %c8_i32 = arith.constant 8 : i32
    %7 = arith.addi %c8_i32, %6 : i32
    %c0_2 = arith.constant 0 : index
    %8 = arith.index_cast %7 : i32 to index
    %c0_3 = arith.constant 0 : index
    %9 = vector.load %arg23[%c0_2, %8, %c0_3] : memref<2x32x32xf32, #tpu.memory_space<vmem>>, vector<1x16x32xf32>
    %10 = vector.shape_cast %9 : vector<1x16x32xf32> to vector<16x32xf32>
    %c1 = arith.constant 1 : index
    %11 = arith.index_cast %7 : i32 to index
    %c0_4 = arith.constant 0 : index
    %12 = vector.load %arg23[%c1, %11, %c0_4] : memref<2x32x32xf32, #tpu.memory_space<vmem>>, vector<1x16x32xf32>
    %13 = vector.shape_cast %12 : vector<1x16x32xf32> to vector<16x32xf32>
    %14 = tpu.concatenate %10, %13 in 0 : vector<16x32xf32>, vector<16x32xf32> -> vector<32x32xf32>
    %15 = arith.truncf %14 : vector<32x32xf32> to vector<32x32xbf16>
    %c5_i32 = arith.constant 5 : i32
    %16 = arith.muli %arg1, %c5_i32 : i32
    %c0_i32_5 = arith.constant 0 : i32
    %17 = arith.addi %16, %c0_i32_5 : i32
    %18 = arith.index_cast %17 : i32 to index
    %c0_6 = arith.constant 0 : index
    %c0_7 = arith.constant 0 : index
    %19 = vector.load %arg8[%18, %c0_6, %c0_7] : memref<15x32x32xbf16, #tpu.memory_space<vmem>>, vector<1x32x32xbf16>
    %20 = vector.shape_cast %19 : vector<1x32x32xbf16> to vector<32x32xbf16>
    %cst = arith.constant dense<0.000000e+00> : vector<32x32xf32>
    %21 = tpu.matmul %15, %20, %cst {dimension_numbers = #tpu.dot_dimension_numbers<[1], [0], [0], [1], [0, 0, 1, 1], [], []>} : vector<32x32xbf16>, vector<32x32xbf16>, vector<32x32xf32> -> vector<32x32xf32>
    %22 = arith.index_cast %17 : i32 to index
    %c0_8 = arith.constant 0 : index
    %c0_9 = arith.constant 0 : index
    %23 = vector.load %arg9[%22, %c0_8, %c0_9] : memref<15x32x32xbf16, #tpu.memory_space<vmem>>, vector<1x32x32xbf16>
    %24 = vector.shape_cast %23 : vector<1x32x32xbf16> to vector<32x32xbf16>
    %cst_10 = arith.constant dense<0.000000e+00> : vector<32x32xf32>
    %25 = tpu.matmul %15, %24, %cst_10 {dimension_numbers = #tpu.dot_dimension_numbers<[1], [0], [0], [1], [0, 0, 1, 1], [], []>} : vector<32x32xbf16>, vector<32x32xbf16>, vector<32x32xf32> -> vector<32x32xf32>
    %c-1_i32 = arith.constant -1 : i32
    %26 = arith.muli %5, %c-1_i32 : i32
    %c8_i32_11 = arith.constant 8 : i32
    %27 = arith.addi %c8_i32_11, %26 : i32
    %c0_12 = arith.constant 0 : index
    %28 = arith.index_cast %27 : i32 to index
    %c0_13 = arith.constant 0 : index
    %29 = vector.load %arg23[%c0_12, %28, %c0_13] : memref<2x32x32xf32, #tpu.memory_space<vmem>>, vector<1x16x32xf32>
    %30 = vector.shape_cast %29 : vector<1x16x32xf32> to vector<16x32xf32>
    %c1_14 = arith.constant 1 : index
    %31 = arith.index_cast %27 : i32 to index
    %c0_15 = arith.constant 0 : index
    %32 = vector.load %arg23[%c1_14, %31, %c0_15] : memref<2x32x32xf32, #tpu.memory_space<vmem>>, vector<1x16x32xf32>
    %33 = vector.shape_cast %32 : vector<1x16x32xf32> to vector<16x32xf32>
    %34 = tpu.concatenate %30, %33 in 0 : vector<16x32xf32>, vector<16x32xf32> -> vector<32x32xf32>
    %35 = arith.truncf %34 : vector<32x32xf32> to vector<32x32xbf16>
    %c5_i32_16 = arith.constant 5 : i32
    %36 = arith.muli %arg1, %c5_i32_16 : i32
    %c1_i32 = arith.constant 1 : i32
    %37 = arith.addi %36, %c1_i32 : i32
    %38 = arith.index_cast %37 : i32 to index
    %c0_17 = arith.constant 0 : index
    %c0_18 = arith.constant 0 : index
    %39 = vector.load %arg8[%38, %c0_17, %c0_18] : memref<15x32x32xbf16, #tpu.memory_space<vmem>>, vector<1x32x32xbf16>
    %40 = vector.shape_cast %39 : vector<1x32x32xbf16> to vector<32x32xbf16>
    %cst_19 = arith.constant dense<0.000000e+00> : vector<32x32xf32>
    %41 = tpu.matmul %35, %40, %cst_19 {dimension_numbers = #tpu.dot_dimension_numbers<[1], [0], [0], [1], [0, 0, 1, 1], [], []>} : vector<32x32xbf16>, vector<32x32xbf16>, vector<32x32xf32> -> vector<32x32xf32>
    %42 = arith.index_cast %37 : i32 to index
    %c0_20 = arith.constant 0 : index
    %c0_21 = arith.constant 0 : index
    %43 = vector.load %arg9[%42, %c0_20, %c0_21] : memref<15x32x32xbf16, #tpu.memory_space<vmem>>, vector<1x32x32xbf16>
    %44 = vector.shape_cast %43 : vector<1x32x32xbf16> to vector<32x32xbf16>
    %cst_22 = arith.constant dense<0.000000e+00> : vector<32x32xf32>
    %45 = tpu.matmul %35, %44, %cst_22 {dimension_numbers = #tpu.dot_dimension_numbers<[1], [0], [0], [1], [0, 0, 1, 1], [], []>} : vector<32x32xbf16>, vector<32x32xbf16>, vector<32x32xf32> -> vector<32x32xf32>
    %46 = arith.addf %21, %41 : vector<32x32xf32>
    %47 = arith.addf %25, %45 : vector<32x32xf32>
    %c0_i32_23 = arith.constant 0 : i32
    %48 = arith.muli %5, %c0_i32_23 : i32
    %c8_i32_24 = arith.constant 8 : i32
    %49 = arith.addi %c8_i32_24, %48 : i32
    %c0_25 = arith.constant 0 : index
    %50 = arith.index_cast %49 : i32 to index
    %c0_26 = arith.constant 0 : index
    %51 = vector.load %arg23[%c0_25, %50, %c0_26] : memref<2x32x32xf32, #tpu.memory_space<vmem>>, vector<1x16x32xf32>
    %52 = vector.shape_cast %51 : vector<1x16x32xf32> to vector<16x32xf32>
    %c1_27 = arith.constant 1 : index
    %53 = arith.index_cast %49 : i32 to index
    %c0_28 = arith.constant 0 : index
    %54 = vector.load %arg23[%c1_27, %53, %c0_28] : memref<2x32x32xf32, #tpu.memory_space<vmem>>, vector<1x16x32xf32>
    %55 = vector.shape_cast %54 : vector<1x16x32xf32> to vector<16x32xf32>
    %56 = tpu.concatenate %52, %55 in 0 : vector<16x32xf32>, vector<16x32xf32> -> vector<32x32xf32>
    %57 = arith.truncf %56 : vector<32x32xf32> to vector<32x32xbf16>
    %c5_i32_29 = arith.constant 5 : i32
    %58 = arith.muli %arg1, %c5_i32_29 : i32
    %c2_i32 = arith.constant 2 : i32
    %59 = arith.addi %58, %c2_i32 : i32
    %60 = arith.index_cast %59 : i32 to index
    %c0_30 = arith.constant 0 : index
    %c0_31 = arith.constant 0 : index
    %61 = vector.load %arg8[%60, %c0_30, %c0_31] : memref<15x32x32xbf16, #tpu.memory_space<vmem>>, vector<1x32x32xbf16>
    %62 = vector.shape_cast %61 : vector<1x32x32xbf16> to vector<32x32xbf16>
    %cst_32 = arith.constant dense<0.000000e+00> : vector<32x32xf32>
    %63 = tpu.matmul %57, %62, %cst_32 {dimension_numbers = #tpu.dot_dimension_numbers<[1], [0], [0], [1], [0, 0, 1, 1], [], []>} : vector<32x32xbf16>, vector<32x32xbf16>, vector<32x32xf32> -> vector<32x32xf32>
    %64 = arith.index_cast %59 : i32 to index
    %c0_33 = arith.constant 0 : index
    %c0_34 = arith.constant 0 : index
    %65 = vector.load %arg9[%64, %c0_33, %c0_34] : memref<15x32x32xbf16, #tpu.memory_space<vmem>>, vector<1x32x32xbf16>
    %66 = vector.shape_cast %65 : vector<1x32x32xbf16> to vector<32x32xbf16>
    %cst_35 = arith.constant dense<0.000000e+00> : vector<32x32xf32>
    %67 = tpu.matmul %57, %66, %cst_35 {dimension_numbers = #tpu.dot_dimension_numbers<[1], [0], [0], [1], [0, 0, 1, 1], [], []>} : vector<32x32xbf16>, vector<32x32xbf16>, vector<32x32xf32> -> vector<32x32xf32>
    %68 = arith.addf %46, %63 : vector<32x32xf32>
    %69 = arith.addf %47, %67 : vector<32x32xf32>
    %c1_i32_36 = arith.constant 1 : i32
    %70 = arith.muli %5, %c1_i32_36 : i32
    %c8_i32_37 = arith.constant 8 : i32
    %71 = arith.addi %c8_i32_37, %70 : i32
    %c0_38 = arith.constant 0 : index
    %72 = arith.index_cast %71 : i32 to index
    %c0_39 = arith.constant 0 : index
    %73 = vector.load %arg23[%c0_38, %72, %c0_39] : memref<2x32x32xf32, #tpu.memory_space<vmem>>, vector<1x16x32xf32>
    %74 = vector.shape_cast %73 : vector<1x16x32xf32> to vector<16x32xf32>
    %c1_40 = arith.constant 1 : index
    %75 = arith.index_cast %71 : i32 to index
    %c0_41 = arith.constant 0 : index
    %76 = vector.load %arg23[%c1_40, %75, %c0_41] : memref<2x32x32xf32, #tpu.memory_space<vmem>>, vector<1x16x32xf32>
    %77 = vector.shape_cast %76 : vector<1x16x32xf32> to vector<16x32xf32>
    %78 = tpu.concatenate %74, %77 in 0 : vector<16x32xf32>, vector<16x32xf32> -> vector<32x32xf32>
    %79 = arith.truncf %78 : vector<32x32xf32> to vector<32x32xbf16>
    %c5_i32_42 = arith.constant 5 : i32
    %80 = arith.muli %arg1, %c5_i32_42 : i32
    %c3_i32 = arith.constant 3 : i32
    %81 = arith.addi %80, %c3_i32 : i32
    %82 = arith.index_cast %81 : i32 to index
    %c0_43 = arith.constant 0 : index
    %c0_44 = arith.constant 0 : index
    %83 = vector.load %arg8[%82, %c0_43, %c0_44] : memref<15x32x32xbf16, #tpu.memory_space<vmem>>, vector<1x32x32xbf16>
    %84 = vector.shape_cast %83 : vector<1x32x32xbf16> to vector<32x32xbf16>
    %cst_45 = arith.constant dense<0.000000e+00> : vector<32x32xf32>
    %85 = tpu.matmul %79, %84, %cst_45 {dimension_numbers = #tpu.dot_dimension_numbers<[1], [0], [0], [1], [0, 0, 1, 1], [], []>} : vector<32x32xbf16>, vector<32x32xbf16>, vector<32x32xf32> -> vector<32x32xf32>
    %86 = arith.index_cast %81 : i32 to index
    %c0_46 = arith.constant 0 : index
    %c0_47 = arith.constant 0 : index
    %87 = vector.load %arg9[%86, %c0_46, %c0_47] : memref<15x32x32xbf16, #tpu.memory_space<vmem>>, vector<1x32x32xbf16>
    %88 = vector.shape_cast %87 : vector<1x32x32xbf16> to vector<32x32xbf16>
    %cst_48 = arith.constant dense<0.000000e+00> : vector<32x32xf32>
    %89 = tpu.matmul %79, %88, %cst_48 {dimension_numbers = #tpu.dot_dimension_numbers<[1], [0], [0], [1], [0, 0, 1, 1], [], []>} : vector<32x32xbf16>, vector<32x32xbf16>, vector<32x32xf32> -> vector<32x32xf32>
    %90 = arith.addf %68, %85 : vector<32x32xf32>
    %91 = arith.addf %69, %89 : vector<32x32xf32>
    %c2_i32_49 = arith.constant 2 : i32
    %92 = arith.muli %5, %c2_i32_49 : i32
    %c8_i32_50 = arith.constant 8 : i32
    %93 = arith.addi %c8_i32_50, %92 : i32
    %c0_51 = arith.constant 0 : index
    %94 = arith.index_cast %93 : i32 to index
    %c0_52 = arith.constant 0 : index
    %95 = vector.load %arg23[%c0_51, %94, %c0_52] : memref<2x32x32xf32, #tpu.memory_space<vmem>>, vector<1x16x32xf32>
    %96 = vector.shape_cast %95 : vector<1x16x32xf32> to vector<16x32xf32>
    %c1_53 = arith.constant 1 : index
    %97 = arith.index_cast %93 : i32 to index
    %c0_54 = arith.constant 0 : index
    %98 = vector.load %arg23[%c1_53, %97, %c0_54] : memref<2x32x32xf32, #tpu.memory_space<vmem>>, vector<1x16x32xf32>
    %99 = vector.shape_cast %98 : vector<1x16x32xf32> to vector<16x32xf32>
    %100 = tpu.concatenate %96, %99 in 0 : vector<16x32xf32>, vector<16x32xf32> -> vector<32x32xf32>
    %101 = arith.truncf %100 : vector<32x32xf32> to vector<32x32xbf16>
    %c5_i32_55 = arith.constant 5 : i32
    %102 = arith.muli %arg1, %c5_i32_55 : i32
    %c4_i32 = arith.constant 4 : i32
    %103 = arith.addi %102, %c4_i32 : i32
    %104 = arith.index_cast %103 : i32 to index
    %c0_56 = arith.constant 0 : index
    %c0_57 = arith.constant 0 : index
    %105 = vector.load %arg8[%104, %c0_56, %c0_57] : memref<15x32x32xbf16, #tpu.memory_space<vmem>>, vector<1x32x32xbf16>
    %106 = vector.shape_cast %105 : vector<1x32x32xbf16> to vector<32x32xbf16>
    %cst_58 = arith.constant dense<0.000000e+00> : vector<32x32xf32>
    %107 = tpu.matmul %101, %106, %cst_58 {dimension_numbers = #tpu.dot_dimension_numbers<[1], [0], [0], [1], [0, 0, 1, 1], [], []>} : vector<32x32xbf16>, vector<32x32xbf16>, vector<32x32xf32> -> vector<32x32xf32>
    %108 = arith.index_cast %103 : i32 to index
    %c0_59 = arith.constant 0 : index
    %c0_60 = arith.constant 0 : index
    %109 = vector.load %arg9[%108, %c0_59, %c0_60] : memref<15x32x32xbf16, #tpu.memory_space<vmem>>, vector<1x32x32xbf16>
    %110 = vector.shape_cast %109 : vector<1x32x32xbf16> to vector<32x32xbf16>
    %cst_61 = arith.constant dense<0.000000e+00> : vector<32x32xf32>
    %111 = tpu.matmul %101, %110, %cst_61 {dimension_numbers = #tpu.dot_dimension_numbers<[1], [0], [0], [1], [0, 0, 1, 1], [], []>} : vector<32x32xbf16>, vector<32x32xbf16>, vector<32x32xf32> -> vector<32x32xf32>
    %112 = arith.addf %90, %107 : vector<32x32xf32>
    %113 = arith.addf %91, %111 : vector<32x32xf32>
    %114 = arith.index_cast %arg1 : i32 to index
    %c0_62 = arith.constant 0 : index
    %c0_63 = arith.constant 0 : index
    %115 = vector.load %arg10[%114, %c0_62, %c0_63] : memref<3x1x32xf32, #tpu.memory_space<vmem>>, vector<1x1x32xf32>
    %116 = vector.shape_cast %115 : vector<1x1x32xf32> to vector<1x32xf32>
    %117 = vector.broadcast %116 : vector<1x32xf32> to vector<32x32xf32>
    %118 = arith.addf %112, %117 : vector<32x32xf32>
    %119 = math.tanh %118 : vector<32x32xf32>
    %120 = arith.index_cast %arg1 : i32 to index
    %c0_64 = arith.constant 0 : index
    %c0_65 = arith.constant 0 : index
    %121 = vector.load %arg11[%120, %c0_64, %c0_65] : memref<3x1x32xf32, #tpu.memory_space<vmem>>, vector<1x1x32xf32>
    %122 = vector.shape_cast %121 : vector<1x1x32xf32> to vector<1x32xf32>
    %123 = vector.broadcast %122 : vector<1x32xf32> to vector<32x32xf32>
    %124 = arith.addf %113, %123 : vector<32x32xf32>
    %125 = arith.negf %124 : vector<32x32xf32>
    %126 = math.exp %125 : vector<32x32xf32>
    %cst_66 = arith.constant 1.000000e+00 : f32
    %127 = vector.broadcast %cst_66 : f32 to vector<32x32xf32>
    %128 = arith.addf %127, %126 : vector<32x32xf32>
    %129 = arith.divf %127, %128 : vector<32x32xf32>
    %130 = arith.mulf %119, %129 : vector<32x32xf32>
    %131 = arith.truncf %130 : vector<32x32xf32> to vector<32x32xbf16>
    %c2_i32_67 = arith.constant 2 : i32
    %132 = arith.cmpi ne, %arg1, %c2_i32_67 : i32
    %133 = arith.extui %132 : i1 to i32
    %c0_i32_68 = arith.constant 0 : i32
    %134 = arith.cmpi ne, %133, %c0_i32_68 : i32
    scf.if %134 {
      %150 = arith.index_cast %arg1 : i32 to index
      %c0_80 = arith.constant 0 : index
      %c0_81 = arith.constant 0 : index
      %151 = vector.load %arg12[%150, %c0_80, %c0_81] : memref<3x32x32xbf16, #tpu.memory_space<vmem>>, vector<1x32x32xbf16>
      %152 = vector.shape_cast %151 : vector<1x32x32xbf16> to vector<32x32xbf16>
      %cst_82 = arith.constant dense<0.000000e+00> : vector<32x32xf32>
      %153 = tpu.matmul %131, %152, %cst_82 {dimension_numbers = #tpu.dot_dimension_numbers<[1], [0], [0], [1], [0, 0, 1, 1], [], []>} : vector<32x32xbf16>, vector<32x32xbf16>, vector<32x32xf32> -> vector<32x32xf32>
      %154 = arith.index_cast %arg1 : i32 to index
      %c0_83 = arith.constant 0 : index
      %c0_84 = arith.constant 0 : index
      %155 = vector.load %arg13[%154, %c0_83, %c0_84] : memref<3x1x32xf32, #tpu.memory_space<vmem>>, vector<1x1x32xf32>
      %156 = vector.shape_cast %155 : vector<1x1x32xf32> to vector<1x32xf32>
      %157 = vector.broadcast %156 : vector<1x32xf32> to vector<32x32xf32>
      %158 = arith.addf %153, %157 : vector<32x32xf32>
      %159 = arith.addf %56, %158 : vector<32x32xf32>
      %160 = vector.broadcast %3 : vector<32x1xf32> to vector<32x32xf32>
      %161 = arith.mulf %159, %160 : vector<32x32xf32>
      %162 = vector.extract_strided_slice %161 {offsets = [0, 0], sizes = [16, 32], strides = [1, 1]} : vector<32x32xf32> to vector<16x32xf32>
      %c0_85 = arith.constant 0 : index
      %c8 = arith.constant 8 : index
      %c0_86 = arith.constant 0 : index
      %163 = vector.load %arg23[%c0_85, %c8, %c0_86] : memref<2x32x32xf32, #tpu.memory_space<vmem>>, vector<1x16x32xf32>
      %164 = vector.shape_cast %163 : vector<1x16x32xf32> to vector<16x32xf32>
      %165 = vector.shape_cast %162 : vector<16x32xf32> to vector<1x16x32xf32>
      tpu.vector_store %arg23[%c0_85, %c8, %c0_86], %165 {strides = array<i32>} : memref<2x32x32xf32, #tpu.memory_space<vmem>>, vector<1x16x32xf32>,
      %166 = vector.extract_strided_slice %161 {offsets = [16, 0], sizes = [16, 32], strides = [1, 1]} : vector<32x32xf32> to vector<16x32xf32>
      %c1_87 = arith.constant 1 : index
      %c8_88 = arith.constant 8 : index
      %c0_89 = arith.constant 0 : index
      %167 = vector.load %arg23[%c1_87, %c8_88, %c0_89] : memref<2x32x32xf32, #tpu.memory_space<vmem>>, vector<1x16x32xf32>
      %168 = vector.shape_cast %167 : vector<1x16x32xf32> to vector<16x32xf32>
      %169 = vector.shape_cast %166 : vector<16x32xf32> to vector<1x16x32xf32>
      tpu.vector_store %arg23[%c1_87, %c8_88, %c0_89], %169 {strides = array<i32>} : memref<2x32x32xf32, #tpu.memory_space<vmem>>, vector<1x16x32xf32>,
    } else {
    }
    %c0_69 = arith.constant 0 : index
    %c0_70 = arith.constant 0 : index
    %135 = vector.load %arg24[%c0_69, %c0_70] : memref<32x32xf32, #tpu.memory_space<vmem>>, vector<32x32xf32>
    %136 = arith.index_cast %arg1 : i32 to index
    %c0_71 = arith.constant 0 : index
    %c0_72 = arith.constant 0 : index
    %137 = vector.load %arg14[%136, %c0_71, %c0_72] : memref<3x32x32xbf16, #tpu.memory_space<vmem>>, vector<1x32x32xbf16>
    %138 = vector.shape_cast %137 : vector<1x32x32xbf16> to vector<32x32xbf16>
    %cst_73 = arith.constant dense<0.000000e+00> : vector<32x32xf32>
    %139 = tpu.matmul %131, %138, %cst_73 {dimension_numbers = #tpu.dot_dimension_numbers<[1], [0], [0], [1], [0, 0, 1, 1], [], []>} : vector<32x32xbf16>, vector<32x32xbf16>, vector<32x32xf32> -> vector<32x32xf32>
    %140 = arith.addf %135, %139 : vector<32x32xf32>
    %141 = arith.index_cast %arg1 : i32 to index
    %c0_74 = arith.constant 0 : index
    %c0_75 = arith.constant 0 : index
    %142 = vector.load %arg15[%141, %c0_74, %c0_75] : memref<3x1x32xf32, #tpu.memory_space<vmem>>, vector<1x1x32xf32>
    %143 = vector.shape_cast %142 : vector<1x1x32xf32> to vector<1x32xf32>
    %144 = vector.broadcast %143 : vector<1x32xf32> to vector<32x32xf32>
    %145 = arith.addf %140, %144 : vector<32x32xf32>
    %c0_76 = arith.constant 0 : index
    %c0_77 = arith.constant 0 : index
    %146 = vector.load %arg24[%c0_76, %c0_77] : memref<32x32xf32, #tpu.memory_space<vmem>>, vector<32x32xf32>
    tpu.vector_store %arg24[%c0_76, %c0_77], %145 {strides = array<i32>} : memref<32x32xf32, #tpu.memory_space<vmem>>, vector<32x32xf32>,
    %c2_i32_78 = arith.constant 2 : i32
    %147 = arith.cmpi eq, %arg1, %c2_i32_78 : i32
    %148 = arith.extui %147 : i1 to i32
    %c0_i32_79 = arith.constant 0 : i32
    %149 = arith.cmpi ne, %148, %c0_i32_79 : i32
    scf.if %149 {
      %c0_80 = arith.constant 0 : index
      %c0_81 = arith.constant 0 : index
      %150 = vector.load %arg24[%c0_80, %c0_81] : memref<32x32xf32, #tpu.memory_space<vmem>>, vector<32x32xf32>
      %151 = vector.broadcast %3 : vector<32x1xf32> to vector<32x32xf32>
      %152 = arith.mulf %150, %151 : vector<32x32xf32>
      %153 = arith.truncf %152 : vector<32x32xf32> to vector<32x32xbf16>
      %c0_82 = arith.constant 0 : index
      %c0_83 = arith.constant 0 : index
      %154 = vector.load %arg16[%c0_82, %c0_83] : memref<32x128xbf16, #tpu.memory_space<vmem>>, vector<32x128xbf16>
      %cst_84 = arith.constant dense<0.000000e+00> : vector<32x128xf32>
      %155 = tpu.matmul %153, %154, %cst_84 {dimension_numbers = #tpu.dot_dimension_numbers<[1], [0], [0], [1], [0, 0, 1, 1], [], []>} : vector<32x32xbf16>, vector<32x128xbf16>, vector<32x128xf32> -> vector<32x128xf32>
      %c0_85 = arith.constant 0 : index
      %c0_86 = arith.constant 0 : index
      %156 = vector.load %arg17[%c0_85, %c0_86] : memref<1x128xf32, #tpu.memory_space<vmem>>, vector<1x128xf32>
      %157 = vector.broadcast %156 : vector<1x128xf32> to vector<32x128xf32>
      %158 = arith.addf %155, %157 : vector<32x128xf32>
      %159 = vector.broadcast %3 : vector<32x1xf32> to vector<32x128xf32>
      %160 = arith.mulf %158, %159 : vector<32x128xf32>
      %c0_87 = arith.constant 0 : index
      %c0_88 = arith.constant 0 : index
      %161 = vector.load %arg18[%c0_87, %c0_88] : memref<32x128xbf16, #tpu.memory_space<vmem>>, vector<32x128xbf16>
      %cst_89 = arith.constant dense<0.000000e+00> : vector<32x128xf32>
      %162 = tpu.matmul %153, %161, %cst_89 {dimension_numbers = #tpu.dot_dimension_numbers<[1], [0], [0], [1], [0, 0, 1, 1], [], []>} : vector<32x32xbf16>, vector<32x128xbf16>, vector<32x128xf32> -> vector<32x128xf32>
      %c0_90 = arith.constant 0 : index
      %c0_91 = arith.constant 0 : index
      %163 = vector.load %arg19[%c0_90, %c0_91] : memref<1x128xf32, #tpu.memory_space<vmem>>, vector<1x128xf32>
      %164 = vector.broadcast %163 : vector<1x128xf32> to vector<32x128xf32>
      %165 = arith.addf %162, %164 : vector<32x128xf32>
      %166 = vector.broadcast %3 : vector<32x1xf32> to vector<32x128xf32>
      %167 = arith.mulf %165, %166 : vector<32x128xf32>
      %168 = vector.extract_strided_slice %160 {offsets = [0, 0], sizes = [16, 128], strides = [1, 1]} : vector<32x128xf32> to vector<16x128xf32>
      %169 = vector.extract_strided_slice %167 {offsets = [0, 0], sizes = [16, 128], strides = [1, 1]} : vector<32x128xf32> to vector<16x128xf32>
      %170 = vector.extract_strided_slice %3 {offsets = [0, 0], sizes = [16, 1], strides = [1, 1]} : vector<32x1xf32> to vector<16x1xf32>
      %c0_92 = arith.constant 0 : index
      %c0_93 = arith.constant 0 : index
      %c0_94 = arith.constant 0 : index
      %171 = vector.load %arg5[%c0_92, %c0_93, %c0_94] : memref<2x16x128xf32, #tpu.memory_space<vmem>>, vector<1x16x128xf32>
      %172 = vector.shape_cast %171 : vector<1x16x128xf32> to vector<16x128xf32>
      %173 = math.exp %169 : vector<16x128xf32>
      %174 = arith.mulf %172, %173 : vector<16x128xf32>
      %175 = arith.addf %168, %174 : vector<16x128xf32>
      %176 = vector.broadcast %170 : vector<16x1xf32> to vector<16x128xf32>
      %177 = arith.mulf %175, %176 : vector<16x128xf32>
      %c0_95 = arith.constant 0 : index
      %c0_96 = arith.constant 0 : index
      %c0_97 = arith.constant 0 : index
      %178 = vector.load %arg20[%c0_95, %c0_96, %c0_97] : memref<2x16x128xf32, #tpu.memory_space<vmem>>, vector<1x16x128xf32>
      %179 = vector.shape_cast %178 : vector<1x16x128xf32> to vector<16x128xf32>
      %180 = vector.shape_cast %177 : vector<16x128xf32> to vector<1x16x128xf32>
      tpu.vector_store %arg20[%c0_95, %c0_96, %c0_97], %180 {strides = array<i32>} : memref<2x16x128xf32, #tpu.memory_space<vmem>>, vector<1x16x128xf32>,
      %c0_98 = arith.constant 0 : index
      %c0_99 = arith.constant 0 : index
      %c0_100 = arith.constant 0 : index
      %181 = vector.load %arg21[%c0_98, %c0_99, %c0_100] : memref<2x16x128xf32, #tpu.memory_space<vmem>>, vector<1x16x128xf32>
      %182 = vector.shape_cast %181 : vector<1x16x128xf32> to vector<16x128xf32>
      %183 = vector.shape_cast %168 : vector<16x128xf32> to vector<1x16x128xf32>
      tpu.vector_store %arg21[%c0_98, %c0_99, %c0_100], %183 {strides = array<i32>} : memref<2x16x128xf32, #tpu.memory_space<vmem>>, vector<1x16x128xf32>,
      %c0_101 = arith.constant 0 : index
      %c0_102 = arith.constant 0 : index
      %c0_103 = arith.constant 0 : index
      %184 = vector.load %arg22[%c0_101, %c0_102, %c0_103] : memref<2x16x128xf32, #tpu.memory_space<vmem>>, vector<1x16x128xf32>
      %185 = vector.shape_cast %184 : vector<1x16x128xf32> to vector<16x128xf32>
      %186 = vector.shape_cast %169 : vector<16x128xf32> to vector<1x16x128xf32>
      tpu.vector_store %arg22[%c0_101, %c0_102, %c0_103], %186 {strides = array<i32>} : memref<2x16x128xf32, #tpu.memory_space<vmem>>, vector<1x16x128xf32>,
      %187 = vector.extract_strided_slice %160 {offsets = [16, 0], sizes = [16, 128], strides = [1, 1]} : vector<32x128xf32> to vector<16x128xf32>
      %188 = vector.extract_strided_slice %167 {offsets = [16, 0], sizes = [16, 128], strides = [1, 1]} : vector<32x128xf32> to vector<16x128xf32>
      %189 = vector.extract_strided_slice %3 {offsets = [16, 0], sizes = [16, 1], strides = [1, 1]} : vector<32x1xf32> to vector<16x1xf32>
      %c1_104 = arith.constant 1 : index
      %c0_105 = arith.constant 0 : index
      %c0_106 = arith.constant 0 : index
      %190 = vector.load %arg5[%c1_104, %c0_105, %c0_106] : memref<2x16x128xf32, #tpu.memory_space<vmem>>, vector<1x16x128xf32>
      %191 = vector.shape_cast %190 : vector<1x16x128xf32> to vector<16x128xf32>
      %192 = math.exp %188 : vector<16x128xf32>
      %193 = arith.mulf %191, %192 : vector<16x128xf32>
      %194 = arith.addf %187, %193 : vector<16x128xf32>
      %195 = vector.broadcast %189 : vector<16x1xf32> to vector<16x128xf32>
      %196 = arith.mulf %194, %195 : vector<16x128xf32>
      %c1_107 = arith.constant 1 : index
      %c0_108 = arith.constant 0 : index
      %c0_109 = arith.constant 0 : index
      %197 = vector.load %arg20[%c1_107, %c0_108, %c0_109] : memref<2x16x128xf32, #tpu.memory_space<vmem>>, vector<1x16x128xf32>
      %198 = vector.shape_cast %197 : vector<1x16x128xf32> to vector<16x128xf32>
      %199 = vector.shape_cast %196 : vector<16x128xf32> to vector<1x16x128xf32>
      tpu.vector_store %arg20[%c1_107, %c0_108, %c0_109], %199 {strides = array<i32>} : memref<2x16x128xf32, #tpu.memory_space<vmem>>, vector<1x16x128xf32>,
      %c1_110 = arith.constant 1 : index
      %c0_111 = arith.constant 0 : index
      %c0_112 = arith.constant 0 : index
      %200 = vector.load %arg21[%c1_110, %c0_111, %c0_112] : memref<2x16x128xf32, #tpu.memory_space<vmem>>, vector<1x16x128xf32>
      %201 = vector.shape_cast %200 : vector<1x16x128xf32> to vector<16x128xf32>
      %202 = vector.shape_cast %187 : vector<16x128xf32> to vector<1x16x128xf32>
      tpu.vector_store %arg21[%c1_110, %c0_111, %c0_112], %202 {strides = array<i32>} : memref<2x16x128xf32, #tpu.memory_space<vmem>>, vector<1x16x128xf32>,
      %c1_113 = arith.constant 1 : index
      %c0_114 = arith.constant 0 : index
      %c0_115 = arith.constant 0 : index
      %203 = vector.load %arg22[%c1_113, %c0_114, %c0_115] : memref<2x16x128xf32, #tpu.memory_space<vmem>>, vector<1x16x128xf32>
      %204 = vector.shape_cast %203 : vector<1x16x128xf32> to vector<16x128xf32>
      %205 = vector.shape_cast %188 : vector<16x128xf32> to vector<1x16x128xf32>
      tpu.vector_store %arg22[%c1_113, %c0_114, %c0_115], %205 {strides = array<i32>} : memref<2x16x128xf32, #tpu.memory_space<vmem>>, vector<1x16x128xf32>,
    } else {
    }
    return
  }
  func.func @transform_0(%arg0: i32, %arg1: i32, %arg2: memref<2xi32, #tpu.memory_space<smem>>, %arg3: memref<3xi32, #tpu.memory_space<smem>>) -> (i32, i32, i32) {
    %c0_i32 = arith.constant 0 : i32
    %c0_i32_0 = arith.constant 0 : i32
    %c0_i32_1 = arith.constant 0 : i32
    return %arg0, %c0_i32, %c0_i32_0 : i32, i32, i32
  }
  func.func @transform_1(%arg0: i32, %arg1: i32, %arg2: memref<2xi32, #tpu.memory_space<smem>>, %arg3: memref<3xi32, #tpu.memory_space<smem>>) -> (i32, i32, i32) {
    %c0_i32 = arith.constant 0 : i32
    %c0_i32_0 = arith.constant 0 : i32
    %c0_i32_1 = arith.constant 0 : i32
    return %arg0, %c0_i32, %c0_i32_0 : i32, i32, i32
  }
  func.func @transform_2(%arg0: i32, %arg1: i32, %arg2: memref<2xi32, #tpu.memory_space<smem>>, %arg3: memref<3xi32, #tpu.memory_space<smem>>) -> (i32, i32) {
    %c0_i32 = arith.constant 0 : i32
    %c0_i32_0 = arith.constant 0 : i32
    %c0_i32_1 = arith.constant 0 : i32
    return %c0_i32, %c0_i32_0 : i32, i32
  }
  func.func @transform_3(%arg0: i32, %arg1: i32, %arg2: memref<2xi32, #tpu.memory_space<smem>>, %arg3: memref<3xi32, #tpu.memory_space<smem>>) -> (i32, i32) {
    %c0_i32 = arith.constant 0 : i32
    %c0_i32_0 = arith.constant 0 : i32
    %c0_i32_1 = arith.constant 0 : i32
    return %c0_i32, %c0_i32_0 : i32, i32
  }
  func.func @transform_4(%arg0: i32, %arg1: i32, %arg2: memref<2xi32, #tpu.memory_space<smem>>, %arg3: memref<3xi32, #tpu.memory_space<smem>>) -> (i32, i32, i32) {
    %c0_i32 = arith.constant 0 : i32
    %c0_i32_0 = arith.constant 0 : i32
    %c0_i32_1 = arith.constant 0 : i32
    %c0_i32_2 = arith.constant 0 : i32
    return %c0_i32, %c0_i32_0, %c0_i32_1 : i32, i32, i32
  }
  func.func @transform_5(%arg0: i32, %arg1: i32, %arg2: memref<2xi32, #tpu.memory_space<smem>>, %arg3: memref<3xi32, #tpu.memory_space<smem>>) -> (i32, i32, i32) {
    %c0_i32 = arith.constant 0 : i32
    %c0_i32_0 = arith.constant 0 : i32
    %c0_i32_1 = arith.constant 0 : i32
    %c0_i32_2 = arith.constant 0 : i32
    return %c0_i32, %c0_i32_0, %c0_i32_1 : i32, i32, i32
  }
  func.func @transform_6(%arg0: i32, %arg1: i32, %arg2: memref<2xi32, #tpu.memory_space<smem>>, %arg3: memref<3xi32, #tpu.memory_space<smem>>) -> (i32, i32, i32) {
    %c0_i32 = arith.constant 0 : i32
    %c0_i32_0 = arith.constant 0 : i32
    %c0_i32_1 = arith.constant 0 : i32
    %c0_i32_2 = arith.constant 0 : i32
    return %c0_i32, %c0_i32_0, %c0_i32_1 : i32, i32, i32
  }
  func.func @transform_7(%arg0: i32, %arg1: i32, %arg2: memref<2xi32, #tpu.memory_space<smem>>, %arg3: memref<3xi32, #tpu.memory_space<smem>>) -> (i32, i32, i32) {
    %c0_i32 = arith.constant 0 : i32
    %c0_i32_0 = arith.constant 0 : i32
    %c0_i32_1 = arith.constant 0 : i32
    %c0_i32_2 = arith.constant 0 : i32
    return %c0_i32, %c0_i32_0, %c0_i32_1 : i32, i32, i32
  }
  func.func @transform_8(%arg0: i32, %arg1: i32, %arg2: memref<2xi32, #tpu.memory_space<smem>>, %arg3: memref<3xi32, #tpu.memory_space<smem>>) -> (i32, i32, i32) {
    %c0_i32 = arith.constant 0 : i32
    %c0_i32_0 = arith.constant 0 : i32
    %c0_i32_1 = arith.constant 0 : i32
    %c0_i32_2 = arith.constant 0 : i32
    return %c0_i32, %c0_i32_0, %c0_i32_1 : i32, i32, i32
  }
  func.func @transform_9(%arg0: i32, %arg1: i32, %arg2: memref<2xi32, #tpu.memory_space<smem>>, %arg3: memref<3xi32, #tpu.memory_space<smem>>) -> (i32, i32, i32) {
    %c0_i32 = arith.constant 0 : i32
    %c0_i32_0 = arith.constant 0 : i32
    %c0_i32_1 = arith.constant 0 : i32
    %c0_i32_2 = arith.constant 0 : i32
    return %c0_i32, %c0_i32_0, %c0_i32_1 : i32, i32, i32
  }
  func.func @transform_10(%arg0: i32, %arg1: i32, %arg2: memref<2xi32, #tpu.memory_space<smem>>, %arg3: memref<3xi32, #tpu.memory_space<smem>>) -> (i32, i32, i32) {
    %c0_i32 = arith.constant 0 : i32
    %c0_i32_0 = arith.constant 0 : i32
    %c0_i32_1 = arith.constant 0 : i32
    %c0_i32_2 = arith.constant 0 : i32
    return %c0_i32, %c0_i32_0, %c0_i32_1 : i32, i32, i32
  }
  func.func @transform_11(%arg0: i32, %arg1: i32, %arg2: memref<2xi32, #tpu.memory_space<smem>>, %arg3: memref<3xi32, #tpu.memory_space<smem>>) -> (i32, i32, i32) {
    %c0_i32 = arith.constant 0 : i32
    %c0_i32_0 = arith.constant 0 : i32
    %c0_i32_1 = arith.constant 0 : i32
    %c0_i32_2 = arith.constant 0 : i32
    return %c0_i32, %c0_i32_0, %c0_i32_1 : i32, i32, i32
  }
  func.func @transform_12(%arg0: i32, %arg1: i32, %arg2: memref<2xi32, #tpu.memory_space<smem>>, %arg3: memref<3xi32, #tpu.memory_space<smem>>) -> (i32, i32) {
    %c0_i32 = arith.constant 0 : i32
    %c0_i32_0 = arith.constant 0 : i32
    %c0_i32_1 = arith.constant 0 : i32
    return %c0_i32, %c0_i32_0 : i32, i32
  }
  func.func @transform_13(%arg0: i32, %arg1: i32, %arg2: memref<2xi32, #tpu.memory_space<smem>>, %arg3: memref<3xi32, #tpu.memory_space<smem>>) -> (i32, i32) {
    %c0_i32 = arith.constant 0 : i32
    %c0_i32_0 = arith.constant 0 : i32
    %c0_i32_1 = arith.constant 0 : i32
    return %c0_i32, %c0_i32_0 : i32, i32
  }
  func.func @transform_14(%arg0: i32, %arg1: i32, %arg2: memref<2xi32, #tpu.memory_space<smem>>, %arg3: memref<3xi32, #tpu.memory_space<smem>>) -> (i32, i32) {
    %c0_i32 = arith.constant 0 : i32
    %c0_i32_0 = arith.constant 0 : i32
    %c0_i32_1 = arith.constant 0 : i32
    return %c0_i32, %c0_i32_0 : i32, i32
  }
  func.func @transform_15(%arg0: i32, %arg1: i32, %arg2: memref<2xi32, #tpu.memory_space<smem>>, %arg3: memref<3xi32, #tpu.memory_space<smem>>) -> (i32, i32) {
    %c0_i32 = arith.constant 0 : i32
    %c0_i32_0 = arith.constant 0 : i32
    %c0_i32_1 = arith.constant 0 : i32
    return %c0_i32, %c0_i32_0 : i32, i32
  }
  func.func @transform_16(%arg0: i32, %arg1: i32, %arg2: memref<2xi32, #tpu.memory_space<smem>>, %arg3: memref<3xi32, #tpu.memory_space<smem>>) -> (i32, i32, i32) {
    %c0_i32 = arith.constant 0 : i32
    %c0_i32_0 = arith.constant 0 : i32
    %c0_i32_1 = arith.constant 0 : i32
    return %arg0, %c0_i32, %c0_i32_0 : i32, i32, i32
  }
  func.func @transform_17(%arg0: i32, %arg1: i32, %arg2: memref<2xi32, #tpu.memory_space<smem>>, %arg3: memref<3xi32, #tpu.memory_space<smem>>) -> (i32, i32, i32) {
    %c0_i32 = arith.constant 0 : i32
    %c0_i32_0 = arith.constant 0 : i32
    %c0_i32_1 = arith.constant 0 : i32
    return %arg0, %c0_i32, %c0_i32_0 : i32, i32, i32
  }
  func.func @transform_18(%arg0: i32, %arg1: i32, %arg2: memref<2xi32, #tpu.memory_space<smem>>, %arg3: memref<3xi32, #tpu.memory_space<smem>>) -> (i32, i32, i32) {
    %c0_i32 = arith.constant 0 : i32
    %c0_i32_0 = arith.constant 0 : i32
    %c0_i32_1 = arith.constant 0 : i32
    return %arg0, %c0_i32, %c0_i32_0 : i32, i32, i32
  }
}

</mosaic_0001>

<bundles_post_ra>
// kernel: tpu_custom_call.1
= control target key start
LH: loop header
LB: loop body
LE: loop exit
PB: predicated region body
PF: predicated region fallthrough
CT: control target
= control target key end

     0   :  { %s2985_s26 = smov [#allocation7]   ;;  %s3487_s0 = inlined_call_operand.hbm [shape: s32[2], index: 0, kind: input, shape index: {}]   ;;  %s3488_s2 = inlined_call_operand.vmem [shape: f32[2,16,8], index: 2, kind: input, shape index: {}]   ;;  %s3489_s3 = inlined_call_operand.hbm [shape: f32[2,16,128], index: 3, kind: input, shape index: {}]   ;;  %s3490_s4 = inlined_call_operand.vmem [shape: bf16[8,32], index: 4, kind: input, shape index: {}]   ;;  %s3491_s5 = inlined_call_operand.hbm [shape: f32[1,32], index: 5, kind: input, shape index: {}]   ;;  %s3492_s6 = inlined_call_operand.hbm [shape: bf16[15,32,32], index: 6, kind: input, shape index: {}]   ;;  %s3493_s7 = inlined_call_operand.hbm [shape: bf16[15,32,32], index: 7, kind: input, shape index: {}]   ;;  %s3494_s8 = inlined_call_operand.vmem [shape: f32[3,1,32], index: 8, kind: input, shape index: {}]   ;;  %s3495_s9 = inlined_call_operand.hbm [shape: f32[3,1,32], index: 9, kind: input, shape index: {}]   ;;  %s3496_s10 = inlined_call_operand.vmem [shape: bf16[3,32,32], index: 10, kind: input, shape index: {}]   ;;  %s3497_s11 = inlined_call_operand.vmem [shape: f32[3,1,32], index: 11, kind: input, shape index: {}]   ;;  %s3498_s12 = inlined_call_operand.hbm [shape: bf16[3,32,32], index: 12, kind: input, shape index: {}]   ;;  %s3499_s13 = inlined_call_operand.hbm [shape: f32[3,1,32], index: 13, kind: input, shape index: {}]   ;;  %s3500_s14 = inlined_call_operand.hbm [shape: bf16[32,128], index: 14, kind: input, shape index: {}]   ;;  %s3501_s15 = inlined_call_operand.vmem [shape: f32[1,128], index: 15, kind: input, shape index: {}]   ;;  %s3502_s16 = inlined_call_operand.hbm [shape: bf16[32,128], index: 16, kind: input, shape index: {}]   ;;  %s3503_s17 = inlined_call_operand.vmem [shape: f32[1,128], index: 17, kind: input, shape index: {}]   ;;  %s3504_s18 = inlined_call_operand.hbm [shape: f32[2,16,128], index: 18, kind: output, shape index: {0}]   ;;  %s3505_s19 = inlined_call_operand.hbm [shape: f32[2,16,128], index: 19, kind: output, shape index: {1}]   ;;  %s3506_s20 = inlined_call_operand.hbm [shape: f32[2,16,128], index: 20, kind: output, shape index: {2}]   ;;  %s3507_s1 = inlined_call_operand.hbm [shape: s32[3], index: 1, kind: input, shape index: {}]  }
   0x1   :  { %3515 = sst [smem:[#allocation35_spill]] %s3487_s0  ;;  %s32_s25 = sshll.u32 %s3507_s1, 4  ;;  %s33_s25 = int_to_ptr.hbm [resolvable:$true] %s32_s25 }
   0x2   :  { %3516 = sst [smem:[#allocation36_spill]] %s3488_s2 }
   0x3   :  { %3517 = sst [smem:[#allocation37_spill]] %s3489_s3 }
   0x4   :  { %3518 = sst [smem:[#allocation38_spill]] %s3490_s4  ;;  %s2984_s4 = smov [#allocation6]  }
   0x5   :  { %3519 = sst [smem:[#allocation39_spill]] %s3491_s5 }
   0x6   :  { %3520 = sst [smem:[#allocation40_spill]] %s3492_s6 }
   0x7   :  { %3521 = sst [smem:[#allocation41_spill]] %s3493_s7 }
   0x8   :  { %3522 = sst [smem:[#allocation42_spill]] %s3495_s9 }
   0x9   :  { %3523 = sst [smem:[#allocation43_spill]] %s3498_s12 }
   0xa   :  { %3524 = sst [smem:[#allocation44_spill]] %s3500_s14 }
   0xb   :  { %3525 = sst [smem:[#allocation45_spill]] %s3501_s15 }
   0xc   :  { %3526 = sst [smem:[#allocation46_spill]] %s3506_s20 }
   0xd   :  { %s3527_s23 = sld [smem:[#allocation35_spill]] }
  0x13   :  { %s27_s15 = sshll.u32 %s3527_s23, 4  ;;  %s28_s15 = int_to_ptr.hbm [resolvable:$true] %s27_s15 }
  0x14   :  { %30 = dma.hbm_to_smem %s28_s15, 16, %s2984_s4, [#allocation5] }
  0x15   :  { %35 = dma.hbm_to_smem %s33_s25, 16, %s2985_s26, [#allocation5] }
  0x16   :  { %2942 = dma.done.wait [#allocation5], 32 }
  0x17   :  { %2943 = vsyncadd [#allocation5], 4294967264 }
  0x18   :  { %38 = sfence }
  0x19   :  { %39 = vsyncpa [#allocation9], 0 }
  0x1a   :  { %40 = vsyncpa [#allocation12], 0 }
  0x1b   :  { %41 = vsyncpa [#allocation15], 0 }
  0x1c   :  { %42 = vsyncpa [#allocation18], 0 }
  0x1d   :  { %43 = vsyncpa [#allocation21], 0 }
  0x1e   :  { %44 = vsyncpa [#allocation10], 0 }
  0x1f   :  { %45 = vsyncpa [#allocation25], 0  ;;  %s3120_s27 = smov 0   ;;  %s3122_s28 = smov 0  }
  0x20   :  { %s3124_s1 = smov 0  }
  0x21 LB: > { %s3528_s29 = sld [smem:[#allocation39_spill]]  ;;  %s3510_s0 = sadd.s32 4294967295, %s2982_s1   ;;  %s2982_s1 = sphi %s3124_s1, %s51_s1   ;;  %s2978_s28 = sphi %s3122_s28, %s3547_s28   ;;  %s2974_s27 = sphi %s3120_s27, %s3546_s27  }
  0x22   : > { %p2067_p0 = scmp.ge.s32.totalorder %s2982_s1, 1  ;;  %p492_p1 = scmp.lt.s32.totalorder %s2982_s1, 4 }
  0x23   : > { %p3143_p2 = scmp.eq.s32.totalorder %s3510_s0, 0  ;;  %s2986_s22 = smov [#allocation11]  }
  0x24   : > { %p3147_p3 = pnand %p2067_p0, %p492_p1  ;;  %s537_s23 = sshll.u32 %s2986_s22, 4  ;;  %s538_s23 = int_to_ptr.vmem [resolvable:$true] %s537_s23 }
  0x25   : > { %s3531_s7 = sld [smem:[#allocation41_spill]]  ;;  %s2987_s26 = smov [#allocation14]  }
  0x26   : > { %p2407_p4 = pneg %p3147_p3  ;;  %s562_s15 = sshll.u32 %s2987_s26, 4  ;;  %s563_s15 = int_to_ptr.vmem [resolvable:$true] %s562_s15 }
  0x27   : > { %s535_s30 = sshll.u32 %s3528_s29, 4  ;;  %s3533_s12 = sld [smem:[#allocation43_spill]]  ;;  %s536_s30 = int_to_ptr.hbm [resolvable:$true] %s535_s30 }
  0x28   : > { %p3158_p5 = pnand %p3143_p2, %p2407_p4  ;;  %s3511_s24 = smov 64  }
  0x29   : > { %s3513_s3 = smov 4   ;;  %s2990_s0 = smov [#allocation17]  }
  0x2a   : > { %2413 = dma.hbm_to_vmem [thread:$0]  (!%p3158_p5), %s536_s30, 16, %s538_s23, [#allocation12]  }
  0x2b   : > { %s560_s25 = sshll.u32 %s3531_s7, 4  ;;  %s599_s7 = sshll.u32 %s2990_s0, 4  ;;  %s561_s25 = int_to_ptr.hbm [resolvable:$true] %s560_s25  ;;  %s600_s7 = int_to_ptr.vmem [resolvable:$true] %s599_s7 }
  0x2c   : > { %2419 = dma.hbm_to_vmem [thread:$0]  (!%p3158_p5), %s561_s25, 3840, %s563_s15, [#allocation15], %s3511_s24, %s3511_s24, %s3513_s3  }
  0x2d   : > { %s597_s22 = sshll.u32 %s3533_s12, 4  ;;  %s3534_s14 = sld [smem:[#allocation44_spill]]  ;;  %s598_s22 = int_to_ptr.hbm [resolvable:$true] %s597_s22 }
  0x2e   : > { %2425 = dma.hbm_to_vmem [thread:$0]  (!%p3158_p5), %s598_s22, 768, %s600_s7, [#allocation18], %s3511_s24, %s3511_s24, %s3513_s3  }
  0x2f   : > { %s2991_s30 = smov [#allocation20]   ;;  %s60_s0 = sadd.s32 1, %s2978_s28 }
  0x30   : > { %s627_s23 = sshll.u32 %s2991_s30, 4  ;;  %p61_p6 = scmp.ge.s32.totalorder %s60_s0, 3  ;;  %s628_s23 = int_to_ptr.vmem [resolvable:$true] %s627_s23 }
  0x31   : > { %s3535_s15 = sld [smem:[#allocation37_spill]]  ;;  %s2992_s26 = smov [#allocation8]  }
  0x32   : > { %s3549_s0 = smov (%p61_p6, %s60_s0), 0  ;;  %s519_s7 = sshll.u32 %s2992_s26, 4  ;;  %s520_s7 = int_to_ptr.vmem [resolvable:$true] %s519_s7 }
  0x33   : > { %s625_s5 = sshll.u32 %s3534_s14, 4  ;;  %s2993_s22 = smov 128   ;;  %s626_s5 = int_to_ptr.hbm [resolvable:$true] %s625_s5 }
  0x34   : > { %2431 = dma.hbm_to_vmem [thread:$0]  (!%p3158_p5), %s626_s5, 256, %s628_s23, [#allocation21], %s3511_s24, %s3511_s24, %s3513_s3  }
  0x35   : > { %s2994_s30 = smov 8   ;;  %s3536_s6 = sld [smem:[#allocation40_spill]] }
  0x36   : > { %s2995_s24 = smov [#allocation13]   ;;  %s3537_s9 = sld [smem:[#allocation42_spill]] }
  0x37   : > { %s517_s29 = sshll.u32 %s3535_s15, 4  ;;  %s548_s20 = sshll.u32 %s2995_s24, 4  ;;  %s518_s29 = int_to_ptr.hbm [resolvable:$true] %s517_s29  ;;  %s549_s20 = int_to_ptr.vmem [resolvable:$true] %s548_s20 }
  0x38   : > { %2410 = dma.hbm_to_vmem [thread:$0]  (!%p3158_p5), %s518_s29, 512, %s520_s7, [#allocation9], %s2993_s22, %s2993_s22, %s2994_s30  }
  0x39   : > { %s3538_s26 = smov 4   ;;  %s3539_s14 = smov 64  }
  0x3a   : > { %s2996_s29 = smov [#allocation16]   ;;  %s2997_s12 = smov 16  }
  0x3b   : > { %s546_s23 = sshll.u32 %s3536_s6, 4  ;;  %s579_s7 = sshll.u32 %s2996_s29, 4  ;;  %s547_s23 = int_to_ptr.hbm [resolvable:$true] %s546_s23  ;;  %s580_s7 = int_to_ptr.vmem [resolvable:$true] %s579_s7 }
  0x3c   : > { %s577_s3 = sshll.u32 %s3537_s9, 4  ;;  %s2998_s22 = smov 1   ;;  %s578_s3 = int_to_ptr.hbm [resolvable:$true] %s577_s3 }
  0x3d   : > { %2416 = dma.hbm_to_vmem [thread:$0]  (!%p3158_p5), %s547_s23, 3840, %s549_s20, [#allocation12], %s3539_s14, %s3539_s14, %s3538_s26  }
  0x3e   : > { %2422 = dma.hbm_to_vmem [thread:$0]  (!%p3158_p5), %s578_s3, 48, %s580_s7, [#allocation15], %s2997_s12, %s2997_s12, %s2998_s22  }
  0x3f   : > { %s611_s5 = sshll.u32 %s3499_s13, 4  ;;  %s2999_s25 = smov [#allocation19]   ;;  %s612_s5 = int_to_ptr.hbm [resolvable:$true] %s611_s5 }
  0x40   : > { %s613_s15 = sshll.u32 %s2999_s25, 4  ;;  %s642_s23 = sshll.u32 %s3502_s16, 4  ;;  %s614_s15 = int_to_ptr.vmem [resolvable:$true] %s613_s15  ;;  %s643_s23 = int_to_ptr.hbm [resolvable:$true] %s642_s23 }
  0x41   : > { %2428 = dma.hbm_to_vmem [thread:$0]  (!%p3158_p5), %s612_s5, 48, %s614_s15, [#allocation18], %s2997_s12, %s2997_s12, %s2998_s22  }
  0x42   : > { %s3000_s20 = smov [#allocation22]   ;;  %663 = sbr.rel (%p3147_p3) target bundleno = 1097 (0x449), region = 84 }
  0x43   : > { %s644_s29 = sshll.u32 %s3000_s20, 4  ;;  %s645_s29 = int_to_ptr.vmem [resolvable:$true] %s644_s29 }
  0x44   : > { %2434 = dma.hbm_to_vmem [thread:$0]  (!%p3158_p5), %s643_s23, 256, %s645_s29, [#allocation21], %s3539_s14, %s3539_s14, %s3538_s26  }
  0x47   : > { %2945 = dma.done.wait (%p3143_p2), [#allocation9], 512  }
  0x48   : > { %2947 = vsyncadd (%p3143_p2), [#allocation9], 4294966784 }
  0x49   : > { %2949 = dma.done.wait (%p3143_p2), [#allocation12], 3856  }
  0x4a   : > { %2951 = vsyncadd (%p3143_p2), [#allocation12], 4294963440 }
  0x4b   : > { %2953 = dma.done.wait (%p3143_p2), [#allocation15], 3888  }
  0x4c   : > { %2955 = vsyncadd (%p3143_p2), [#allocation15], 4294963408 }
  0x4d   : > { %2957 = dma.done.wait (%p3143_p2), [#allocation18], 816  }
  0x4e   : > { %2959 = vsyncadd (%p3143_p2), [#allocation18], 4294966480 }
  0x4f   : > { %2961 = dma.done.wait (%p3143_p2), [#allocation21], 512  }
  0x50   : > { %2963 = vsyncadd (%p3143_p2), [#allocation21], 4294966784  ;;  %p2088_p7 = scmp.ne.s32.totalorder %s2974_s27, 0 }
  0x51   : > { %s3540_s14 = sld [smem:[#allocation38_spill]] (!%p2088_p7) }
  0x52   : > { %769 = sbr.rel (%p2088_p7) target bundleno = 232 (0xe8), region = 124  ;;  %s3541_s7 = sld [smem:[#allocation36_spill]] (!%p2088_p7) }
  0x53   : > { %s774_s25 = sld [smem:[#allocation6]] (!%p2088_p7) }
  0x54   : > { %s2092_s15 = sld [smem:[#allocation6 + $0x1]] (!%p2088_p7) }
  0x57   : > { %v788_v0 = vld [vmem:[%s3540_s14] sm:$0xf]  ;;  %vm797_vm0 = vcmask 1043456   ;;  %v770_v8 = vlaneseq  ;;  %vm793_vm1 = vcmask 64512   ;;  %vm782_vm2 = vcmask 7168  }
  0x58   : > { %v837_v1 = vld [vmem:[%s3540_s14] sm:$0xf]  ;;  %v799_v3 = vsel %vm797_vm0, %v788_v0, 0  ;;  %v786_v5 = vld [vmem:[%s3541_s7 + $0x8] sm:$0xff]  ;;  %v2095_v6 = vld [vmem:[%s3541_s7 + $0x10] sm:$0xff]  ;;  %v3001_v13 = vmov 0.0  }
  0x59   : > { %v785_v2 = vld [vmem:[%s3541_s7] sm:$0xff]  ;;  %v846_v4 = vsel %vm797_vm0, %v837_v1, 0  ;;  %v2096_v7 = vld [vmem:[%s3541_s7 + $0x18] sm:$0xff]  ;;  %808 = vmatpush.bf16.msra.mxu0 %v799_v3  ;;  %v771_v11 = vshrl.u32 %v770_v8, 7  ;;  %v775_v12 = vstv %s774_s25  ;;  %vm817_vm5 = vcmask 261120  }
  0x5a   : > { %855 = vmatpush.bf16.msra.mxu1 %v846_v4  ;;  %v787_v9 = vpack.c.bf16 %v786_v5, %v785_v2  ;;  %v836_v10 = vpack.c.bf16 %v2096_v7, %v2095_v6  ;;  %v824_v15 = vstv %s2092_s15  ;;  %818 = vst.msk [vmem:[#allocation2] sm:$0xff] %vm817_vm5, %v3001_v13  ;;  %v2508_v20 = vld [vmem:[#allocation11] ss:$0 sm:$0xff] }
  0x5b   : > { %vm776_vm3 = vcmp.lt.s32.totalorder %v771_v11, %v775_v12  ;;  %vm825_vm4 = vcmp.lt.s32.totalorder %v771_v11, %v824_v15  ;;  %819 = vst.msk [vmem:[#allocation2 + $0x18] sm:$0xff] %vm817_vm5, %v3001_v13  ;;  %v772_v17 = vadd.s32 8, %v771_v11  ;;  %v2509_v21 = vld [vmem:[#allocation11] ss:$0 sm:$0xff] }
  0x5c   : > { %2091 = vmatmul.msk.bf16.vlgmr.msra.gmra.mxu0 %vm793_vm1, %v787_v9  ;;  %v2089_v14 = vsel %vm776_vm3, 1.0, %v3001_v13  ;;  %v2093_v16 = vsel %vm825_vm4, 1.0, %v3001_v13  ;;  %865 = vst.msk [vmem:[#allocation2 + $0x20] sm:$0xff] %vm817_vm5, %v3001_v13 }
  0x5d   : > { %2097 = vmatmul.msk.bf16.vlgmr.msra.gmra.mxu1 %vm793_vm1, %v836_v10  ;;  %783 = vst.msk [vmem:[#allocation4] sm:$0xff] %vm782_vm2, %v2089_v14  ;;  %vm777_vm6 = vcmp.lt.s32.totalorder %v772_v17, %v775_v12  ;;  %vm826_vm7 = vcmp.lt.s32.totalorder %v772_v17, %v824_v15 }
  0x5e   : > { %831 = vst.msk [vmem:[#allocation4 + $0x10] sm:$0xff] %vm782_vm2, %v2093_v16  ;;  %v2090_v18 = vsel %vm777_vm6, 1.0, %v3001_v13  ;;  %v2094_v19 = vsel %vm826_vm7, 1.0, %v3001_v13 }
  0x5f   : > { %866 = vst.msk [vmem:[#allocation2 + $0x38] sm:$0xff] %vm817_vm5, %v3001_v13 }
  0x60   : > { %869 = vst.msk [vmem:[#allocation3] sm:$0xff] %vm817_vm5, %v3001_v13 }
  0x61   : > { %870 = vst.msk [vmem:[#allocation3 + $0x8] sm:$0xff] %vm817_vm5, %v3001_v13 }
  0x62   : > { %871 = vst.msk [vmem:[#allocation3 + $0x10] sm:$0xff] %vm817_vm5, %v3001_v13 }
  0x63   : > { %872 = vst.msk [vmem:[#allocation3 + $0x18] sm:$0xff] %vm817_vm5, %v3001_v13 }
  0x64   : > { %784 = vst.msk [vmem:[#allocation4 + $0x8] sm:$0xff] %vm782_vm2, %v2090_v18 }
  0x65   : > { %832 = vst.msk [vmem:[#allocation4 + $0x18] sm:$0xff] %vm782_vm2, %v2094_v19 }
  0xd9   : > { %v810_v22 = vpop.f32.mrf.mxu0 }
  0xda   : > { %v857_v23 = vpop.f32.mrf.mxu1  ;;  %v811_v24 = vadd.f32 %v2508_v20, %v810_v22 }
  0xdb   : > { %v858_v25 = vadd.f32 %v2509_v21, %v857_v23 }
  0xdc   : > { %v815_v26 = vmul.f32 %v2089_v14, %v811_v24 }
  0xdd   : > { %v862_v27 = vmul.f32 %v2093_v16, %v858_v25 }
  0xde   : > { %820 = vst.msk [vmem:[#allocation2 + $0x8] sm:$0xff] %vm817_vm5, %v815_v26 }
  0xdf   : > { %867 = vst.msk [vmem:[#allocation2 + $0x28] sm:$0xff] %vm817_vm5, %v862_v27 }
  0xe1   : > { %v812_v28 = vpop.f32.mrf.mxu0 }
  0xe2   : > { %v859_v29 = vpop.f32.mrf.mxu1  ;;  %v813_v30 = vadd.f32 %v2508_v20, %v812_v28 }
  0xe3   : > { %v860_v31 = vadd.f32 %v2509_v21, %v859_v29 }
  0xe4   : > { %v816_v32 = vmul.f32 %v2090_v18, %v813_v30 }
  0xe5   : > { %v863_v33 = vmul.f32 %v2094_v19, %v860_v31 }
  0xe6   : > { %821 = vst.msk [vmem:[#allocation2 + $0x10] sm:$0xff] %vm817_vm5, %v816_v32 }
  0xe7   : > { %868 = vst.msk [vmem:[#allocation2 + $0x30] sm:$0xff] %vm817_vm5, %v863_v33 }
  0xe8 PF: > { %s2315_s23 = smul.u32 80, %s2974_s27  ;;  %s3278_s20 = sld [smem:[#allocation7 + %s2974_s27]]  ;;  %v3280_v34 = vld [vmem:[#allocation4] sm:$0xff]  ;;  %v3282_v35 = vld [vmem:[#allocation4 + $0x8] sm:$0xff]  ;;  %v3284_v36 = vld [vmem:[#allocation4 + $0x10] sm:$0xff]  ;;  %vm933_vm8 = vcmask 261120  }
  0xe9   : > { %v3286_v37 = vld [vmem:[#allocation4 + $0x18] sm:$0xff]  ;;  %v3317_v63 = vld [vmem:[#allocation2 + $0x8] sm:$0xff]  ;;  %s1362_s30 = scalar_lea.vmem %s3494_s8, %s2974_s27  ;;  %s1375_s5 = scalar_lea.vmem [#allocation16], %s2974_s27 }
  0xea   : > { %s3288_s29 = scalar_lea.vmem [#allocation13], %s2315_s23  ;;  %s3291_s6 = scalar_lea.vmem [#allocation14], %s2315_s23  ;;  %v3328_v8 = vld [vmem:[#allocation2 + $0x28] sm:$0xff] }
  0xeb   : > { %v2322_v38 = vld [vmem:[%s3288_s29 + $0x18] sm:$0xff]  ;;  %v2321_v40 = vld [vmem:[%s3288_s29 + $0x10] sm:$0xff]  ;;  %v2320_v42 = vld [vmem:[%s3291_s6 + $0x8] sm:$0xff]  ;;  %p2261_p8 = scmp.eq.s32.totalorder %s2974_s27, 2 }
  0xec   : > { %v2324_v39 = vld [vmem:[%s3291_s6 + $0x18] sm:$0xff]  ;;  %2347 = vmatpush.bf16.msra.mxu2 %v2322_v38  ;;  %v2323_v41 = vld [vmem:[%s3291_s6 + $0x10] sm:$0xff]  ;;  %946 = vmatpush.bf16.msra.mxu0 %v2322_v38  ;;  %v2328_v43 = vld [vmem:[%s3291_s6 + $0x28] sm:$0xff]  ;;  %s2337_s23 = sshll.u32 (!%p2261_p8), %s2974_s27, 4 }
  0xed   : > { %983 = vmatpush.bf16.msra.mxu1 %v2324_v39  ;;  %2349 = vmatpush.bf16.msra.mxu3 %v2324_v39  ;;  %v2317_v50 = vld [vmem:[%s3288_s29 + $0x8] sm:$0xff]  ;;  %v2319_v52 = vld [vmem:[%s3291_s6] sm:$0xff]  ;;  %v2332_v54 = vld [vmem:[%s3291_s6 + $0x38] sm:$0xff] }
  0xee   : > { %s903_s9 = ssub.s32 8, %s3278_s20  ;;  %v2326_v51 = vld [vmem:[%s3288_s29 + $0x28] sm:$0xff]  ;;  %v2327_v53 = vld [vmem:[%s3291_s6 + $0x20] sm:$0xff]  ;;  %s1875_s4 = smul.u32 4294967294, %s3278_s20  ;;  %v2330_v58 = vld [vmem:[%s3288_s29 + $0x38] sm:$0xff] }
  0xef   : > { %s904_s2 = scalar_lea.vmem [#allocation2], %s903_s9  ;;  %v2336_v55 = vld [vmem:[%s3291_s6 + $0x48] sm:$0xff]  ;;  %v2316_v56 = vld [vmem:[%s3288_s29] sm:$0xff]  ;;  %v2331_v60 = vld [vmem:[%s3291_s6 + $0x30] sm:$0xff]  ;;  %s2221_s26 = sshll.u32 %s3278_s20, 1 }
  0xf0   : > { %v2105_v44 = vld [vmem:[%s904_s2 + $0x20] sm:$0xff]  ;;  %v2106_v45 = vld [vmem:[%s904_s2 + $0x28] sm:$0xff]  ;;  %2348 = vmatpush.bf16.msra.mxu2 %v2321_v40  ;;  %947 = vmatpush.bf16.msra.mxu0 %v2321_v40  ;;  %v2329_v62 = vld [vmem:[%s3288_s29 + $0x30] sm:$0xff]  ;;  %s1876_s3 = scalar_lea.vmem [#allocation2], %s1875_s4  ;;  %s1904_s21 = scalar_lea.vmem [#allocation2], %s3278_s20 }
  0xf1   : > { %v905_v46 = vld [vmem:[%s904_s2] sm:$0xff]  ;;  %984 = vmatpush.bf16.msra.mxu1 %v2323_v41  ;;  %v912_v47 = vpack.c.bf16 %v2106_v45, %v2105_v44  ;;  %v906_v48 = vld [vmem:[%s904_s2 + $0x8] sm:$0xff]  ;;  %2350 = vmatpush.bf16.msra.mxu3 %v2323_v41  ;;  %v2099_v1 = vld [vmem:[%s1876_s3 + $0x10] sm:$0xff]  ;;  %s1917_s12 = scalar_lea.vmem [#allocation2], %s2221_s26  ;;  %s1472_s4 = scalar_lea.vmem (!%p2261_p8), %s3496_s10, %s2337_s23 }
  0xf2   : > { %v911_v49 = vpack.c.bf16 %v906_v48, %v905_v46  ;;  %v2325_v57 = vld [vmem:[%s3288_s29 + $0x20] sm:$0xff]  ;;  %v2334_v59 = vld [vmem:[%s3288_s29 + $0x48] sm:$0xff]  ;;  %v3319_v2 = vld [vmem:[#allocation2 + $0x10] sm:$0xff] }
  0xf3   : > { %2121 = vmatmul.msk.bf16.vlgmr.msra.gmra.mxu2 %vm933_vm8, %v912_v47  ;;  %v2335_v61 = vld [vmem:[%s3291_s6 + $0x40] sm:$0xff]  ;;  %v2098_v0 = vld [vmem:[%s1876_s3 + $0x8] sm:$0xff]  ;;  %v1069_v4 = vpack.c.bf16 %v3319_v2, %v3317_v63  ;;  %v2101_v7 = vld [vmem:[%s1876_s3 + $0x30] sm:$0xff]  ;;  %s1477_s6 = scalar_lea.vmem (!%p2261_p8), %s3497_s11, %s2974_s27 }
  0xf4   : > { %2135 = vmatmul.msk.bf16.vlgmr.msra.gmra.mxu1 %vm933_vm8, %v911_v49  ;;  %2136 = vmatmul.msk.bf16.vlgmr.msra.gmra.mxu3 %vm933_vm8, %v912_v47  ;;  %v887_v3 = vpack.c.bf16 %v2099_v1, %v2098_v0  ;;  %v2333_v5 = vld [vmem:[%s3288_s29 + $0x40] sm:$0xff]  ;;  %v2100_v6 = vld [vmem:[%s1876_s3 + $0x28] sm:$0xff]  ;;  %v3330_v9 = vld [vmem:[#allocation2 + $0x30] sm:$0xff] }
  0xf5   : > { %1051 = vmatpush.bf16.msrb.mxu3 %v2320_v42  ;;  %1140 = vmatpush.bf16.msrb.mxu1 %v2328_v43  ;;  %v888_v10 = vpack.c.bf16 %v2101_v7, %v2100_v6  ;;  %v1070_v11 = vpack.c.bf16 %v3330_v9, %v3328_v8  ;;  %v2187_v12 = vld [vmem:[%s1904_s21 + $0x8] sm:$0xff]  ;;  %v2188_v13 = vld [vmem:[%s1904_s21 + $0x10] sm:$0xff] }
  0xf6   : > { %2120 = vmatmul.msk.bf16.vlgmr.msra.gmra.mxu0 %vm933_vm8, %v911_v49  ;;  %1020 = vmatpush.bf16.msrb.mxu2 %v2317_v50  ;;  %v2222_v14 = vld [vmem:[%s1917_s12 + $0x8] sm:$0xff]  ;;  %v2223_v15 = vld [vmem:[%s1917_s12 + $0x10] sm:$0xff]  ;;  %v1169_v16 = vpack.c.bf16 %v2188_v13, %v2187_v12 }
  0xf7   : > { %1103 = vmatpush.bf16.msrb.mxu0 %v2326_v51  ;;  %v1270_v17 = vpack.c.bf16 %v2223_v15, %v2222_v14  ;;  %v2189_v18 = vld [vmem:[%s1904_s21 + $0x28] sm:$0xff]  ;;  %v2190_v19 = vld [vmem:[%s1904_s21 + $0x30] sm:$0xff] }
  0xf8   : > { %v2225_v20 = vld [vmem:[%s1917_s12 + $0x28] sm:$0xff]  ;;  %v2226_v21 = vld [vmem:[%s1917_s12 + $0x30] sm:$0xff]  ;;  %v1170_v22 = vpack.c.bf16 %v2190_v19, %v2189_v18 }
  0xf9   : > { %1052 = vmatpush.bf16.msrb.mxu3 %v2319_v52  ;;  %1141 = vmatpush.bf16.msrb.mxu1 %v2327_v53  ;;  %v1271_v23 = vpack.c.bf16 %v2226_v21, %v2225_v20 }
  0xfa   : > { %1021 = vmatpush.bf16.msrb.mxu2 %v2316_v56 }
  0xfb   : > { %1104 = vmatpush.bf16.msrb.mxu0 %v2325_v57  ;;  %v2510_v57 = vld [vmem:[%s1375_s5] ss:$0 sm:$0xff] }
  0xfd   : > { %1240 = vmatpush.bf16.msra.mxu3 %v2332_v54  ;;  %1341 = vmatpush.bf16.msra.mxu1 %v2336_v55 }
  0xfe   : > { %1203 = vmatpush.bf16.msra.mxu2 %v2330_v58 }
  0xff   : > { %1304 = vmatpush.bf16.msra.mxu0 %v2334_v59 }
 0x101   : > { %1241 = vmatpush.bf16.msra.mxu3 %v2331_v60  ;;  %1342 = vmatpush.bf16.msra.mxu1 %v2335_v61 }
 0x102   : > { %1204 = vmatpush.bf16.msra.mxu2 %v2329_v62 }
 0x103   : > { %2145 = vmatmul.msk.bf16.vlgmr.msrb.gmra.mxu2 %vm933_vm8, %v887_v3  ;;  %1305 = vmatpush.bf16.msra.mxu0 %v2333_v5 }
 0x104   : > { %2185 = vmatmul.msk.bf16.vlgmr.msrb.gmra.mxu1 %vm933_vm8, %v1069_v4  ;;  %2155 = vmatmul.msk.bf16.vlgmr.msrb.gmra.mxu3 %vm933_vm8, %v887_v3 }
 0x106   : > { %2170 = vmatmul.msk.bf16.vlgmr.msrb.gmra.mxu0 %vm933_vm8, %v1069_v4 }
 0x113   : > { %2146 = vmatmul.msk.bf16.gmra.mxu2 %vm933_vm8, %v888_v10 }
 0x114   : > { %2186 = vmatmul.msk.bf16.gmra.mxu1 %vm933_vm8, %v1070_v11  ;;  %2156 = vmatmul.msk.bf16.gmra.mxu3 %vm933_vm8, %v888_v10 }
 0x116   : > { %2171 = vmatmul.msk.bf16.gmra.mxu0 %vm933_vm8, %v1070_v11 }
 0x123   : > { %2204 = vmatmul.msk.bf16.vlgmr.msra.gmra.mxu2 %vm933_vm8, %v1169_v16 }
 0x124   : > { %2255 = vmatmul.msk.bf16.vlgmr.msra.gmra.mxu1 %vm933_vm8, %v1270_v17  ;;  %2219 = vmatmul.msk.bf16.vlgmr.msra.gmra.mxu3 %vm933_vm8, %v1169_v16 }
 0x126   : > { %2240 = vmatmul.msk.bf16.vlgmr.msra.gmra.mxu0 %vm933_vm8, %v1270_v17 }
 0x133   : > { %2205 = vmatmul.msk.bf16.gmra.mxu2 %vm933_vm8, %v1170_v22 }
 0x134   : > { %2256 = vmatmul.msk.bf16.gmra.mxu1 %vm933_vm8, %v1271_v23  ;;  %2220 = vmatmul.msk.bf16.gmra.mxu3 %vm933_vm8, %v1170_v22 }
 0x136   : > { %2241 = vmatmul.msk.bf16.gmra.mxu0 %vm933_vm8, %v1271_v23 }
 0x171   : > { %v986_v24 = vpop.f32.mrf.mxu1 }
 0x173   : > { %v949_v26 = vpop.f32.mrf.mxu0 }
 0x176   : > { %v3353_v25 = vpop.f32.mrf.mxu2 }
 0x177   : > { %v991_v27 = vpop.f32.mrf.mxu3 }
 0x179   : > { %v988_v28 = vpop.f32.mrf.mxu1 }
 0x17b   : > { %v951_v31 = vpop.f32.mrf.mxu0 }
 0x17e   : > { %v3355_v29 = vpop.f32.mrf.mxu2 }
 0x17f   : > { %v993_v30 = vpop.f32.mrf.mxu3 }
 0x181   : > { %v1143_v32 = vpop.f32.mrf.mxu1 }
 0x183   : > { %v1106_v40 = vpop.f32.mrf.mxu0 }
 0x186   : > { %v1023_v33 = vpop.f32.mrf.mxu2 }
 0x187   : > { %v1054_v38 = vpop.f32.mrf.mxu3  ;;  %v1024_v5 = vadd.f32 %v1023_v33, %v949_v26 }
 0x188   : > { %v1055_v50 = vadd.f32 %v1054_v38, %v986_v24 }
 0x189   : > { %v1145_v39 = vpop.f32.mrf.mxu1  ;;  %v1153_v12 = vadd.f32 %v1106_v40, %v1024_v5 }
 0x18a   : > { %v1157_v53 = vadd.f32 %v1143_v32, %v1055_v50 }
 0x18b   : > { %v1108_v44 = vpop.f32.mrf.mxu0 }
 0x18e   : > { %v1025_v42 = vpop.f32.mrf.mxu2 }
 0x18f   : > { %v1056_v41 = vpop.f32.mrf.mxu3  ;;  %v1026_v22 = vadd.f32 %v1025_v42, %v951_v31 }
 0x190   : > { %v1057_v58 = vadd.f32 %v1056_v41, %v988_v28 }
 0x191   : > { %v1148_v43 = vpop.f32.mrf.mxu1  ;;  %v1154_v33 = vadd.f32 %v1108_v44, %v1026_v22 }
 0x192   : > { %v1158_v1 = vadd.f32 %v1145_v39, %v1057_v58 }
 0x193   : > { %v3357_v48 = vpop.f32.mrf.mxu0 }
 0x196   : > { %v1028_v47 = vpop.f32.mrf.mxu2 }
 0x197   : > { %v1059_v45 = vpop.f32.mrf.mxu3  ;;  %v1029_v50 = vadd.f32 %v1028_v47, %v3353_v25 }
 0x198   : > { %v1060_v6 = vadd.f32 %v1059_v45, %v991_v27  ;;  %v3370_v27 = vld [vmem:[%s1362_s30] ss:$0 sm:$0xff] }
 0x199   : > { %v1150_v46 = vpop.f32.mrf.mxu1 }
 0x19a   : > { %v1159_v15 = vadd.f32 %v1148_v43, %v1060_v6 }
 0x19b   : > { %v3361_v55 = vpop.f32.mrf.mxu0 }
 0x19e   : > { %v3359_v52 = vpop.f32.mrf.mxu2 }
 0x19f   : > { %v1061_v49 = vpop.f32.mrf.mxu3 }
 0x1a0   : > { %v1062_v23 = vadd.f32 %v1061_v49, %v993_v30 }
 0x1a1   : > { %v1344_v51 = vpop.f32.mrf.mxu1 }
 0x1a2   : > { %v1160_v40 = vadd.f32 %v1150_v46, %v1062_v23 }
 0x1a3   : > { %v1307_v7 = vpop.f32.mrf.mxu0 }
 0x1a6   : > { %v1206_v62 = vpop.f32.mrf.mxu2 }
 0x1a7   : > { %v1243_v54 = vpop.f32.mrf.mxu3  ;;  %v1253_v16 = vadd.f32 %v1206_v62, %v1153_v12 }
 0x1a8   : > { %v1257_v56 = vadd.f32 %v1243_v54, %v1157_v53 }
 0x1a9   : > { %v1346_v61 = vpop.f32.mrf.mxu1  ;;  %v1354_v26 = vadd.f32 %v1307_v7, %v1253_v16 }
 0x1aa   : > { %v1358_v59 = vadd.f32 %v1344_v51, %v1257_v56 }
 0x1ab   : > { %v1309_v28 = vpop.f32.mrf.mxu0  ;;  %v1367_v43 = vadd.f32 %v3370_v27, %v1354_v26 }
 0x1ac   : > { %v1380_v60 = vadd.f32 %v2510_v57, %v1358_v59 }
 0x1ae   : > { %v2257_v0 = vmul.f32 -1.442695, %v1380_v60  ;;  %v1208_v20 = vpop.f32.mrf.mxu2 }
 0x1af   : > { %v1245_v3 = vpop.f32.mrf.mxu3  ;;  %v1254_v31 = vadd.f32 %v1208_v20, %v1154_v33 }
 0x1b0   : > { %2512 = vpow2.f32 %v2257_v0  ;;  %v1258_v4 = vadd.f32 %v1245_v3, %v1158_v1 }
 0x1b1   : > { %v1349_v18 = vpop.f32.mrf.mxu1  ;;  %v1355_v58 = vadd.f32 %v1309_v28, %v1254_v31 }
 0x1b2   : > { %v1359_v10 = vadd.f32 %v1346_v61, %v1258_v4  ;;  %v1155_v61 = vadd.f32 %v3357_v48, %v1029_v50  ;;  %v1031_v48 = vadd.f32 %v3359_v52, %v3355_v29 }
 0x1b3   : > { %v1312_v1 = vpop.f32.mrf.mxu0  ;;  %v1368_v4 = vadd.f32 %v3370_v27, %v1355_v58 }
 0x1b4   : > { %v1381_v11 = vadd.f32 %v2510_v57, %v1359_v10 }
 0x1b6   : > { %v2513_v13 = vpop.eup %2512  ;;  %v2258_v14 = vmul.f32 -1.442695, %v1381_v11  ;;  %v1211_v54 = vpop.f32.mrf.mxu2 }
 0x1b7   : > { %v1396_v17 = vadd.f32 1.0, %v2513_v13  ;;  %v1248_v19 = vpop.f32.mrf.mxu3  ;;  %v1255_v5 = vadd.f32 %v1211_v54, %v1155_v61 }
 0x1b8   : > { %2514 = vpow2.f32 %v2258_v14  ;;  %v1259_v21 = vadd.f32 %v1248_v19, %v1159_v15  ;;  %v1156_v19 = vadd.f32 %v3361_v55, %v1031_v48 }
 0x1b9   : > { %2516 = vrcp.f32 %v1396_v17  ;;  %v1351_v51 = vpop.f32.mrf.mxu1  ;;  %v1411_v44 = vand.u32 2147483648, %v1396_v17  ;;  %v1409_v59 = vand.u32 2147483647, %v1396_v17  ;;  %vm1405_vm10 = vweird.f32 %v1396_v17 }
 0x1ba   : > { %v1360_v24 = vadd.f32 %v1349_v18, %v1259_v21  ;;  %v1356_v15 = vadd.f32 %v1312_v1, %v1255_v5 }
 0x1bb   : > { %v1412_v47 = vor.u32 1.1754944e-38, %v1411_v44  ;;  %vm1410_vm12 = vcmp.eq.f32.partialorder %v1409_v59, 8.507059e+37 }
 0x1bc   : > { %v1382_v32 = vadd.f32 %v2510_v57, %v1360_v24  ;;  %v1369_v29 = vadd.f32 %v3370_v27, %v1356_v15 }
 0x1be   : > { %v2515_v38 = vpop.eup %2514  ;;  %v2259_v39 = vmul.f32 -1.442695, %v1382_v32  ;;  %v1213_v18 = vpop.f32.mrf.mxu2 }
 0x1bf   : > { %v2517_v41 = vpop.eup %2516  ;;  %v1397_v42 = vadd.f32 1.0, %v2515_v38  ;;  %v1250_v30 = vpop.f32.mrf.mxu3  ;;  %v1256_v52 = vadd.f32 %v1213_v18, %v1156_v19 }
 0x1c0   : > { %v1401_v45 = vmul.f32 %v2517_v41, %v1396_v17  ;;  %2518 = vpow2.f32 %v2259_v39  ;;  %v1260_v49 = vadd.f32 %v1250_v30, %v1160_v40  ;;  %vm1406_vm9 = vweird.f32 %v2517_v41  ;;  %v1314_v32 = vpop.f32.mrf.mxu0 }
 0x1c1   : > { %2520 = vrcp.f32 %v1397_v42  ;;  %vm1407_vm11 = vmor %vm1405_vm10, %vm1406_vm9  ;;  %v1426_v14 = vand.u32 2147483648, %v1397_v42  ;;  %v1424_v17 = vand.u32 2147483647, %v1397_v42  ;;  %vm1420_vm14 = vweird.f32 %v1397_v42 }
 0x1c2   : > { %v1402_v53 = vsub.f32 1.0, %v1401_v45  ;;  %v1361_v56 = vadd.f32 %v1351_v51, %v1260_v49  ;;  %2522 = vtanh.f32 %v1367_v43 }
 0x1c3   : > { %v1427_v23 = vor.u32 1.1754944e-38, %v1426_v14  ;;  %vm1425_vm0 = vcmp.eq.f32.partialorder %v1424_v17, 8.507059e+37 }
 0x1c4   : > { %v1403_v46 = vmul.f32 %v2517_v41, %v1402_v53  ;;  %v1383_v60 = vadd.f32 %v2510_v57, %v1361_v56 }
 0x1c6   : > { %v2519_v62 = vpop.eup %2518  ;;  %v1404_v0 = vadd.f32 %v2517_v41, %v1403_v46  ;;  %v2260_v3 = vmul.f32 -1.442695, %v1383_v60 }
 0x1c7   : > { %v2521_v25 = vpop.eup %2520  ;;  %v1398_v6 = vadd.f32 1.0, %v2519_v62 }
 0x1c8   : > { %v1408_v7 = vsel %vm1407_vm11, %v2517_v41, %v1404_v0  ;;  %v1416_v10 = vmul.f32 %v2521_v25, %v1397_v42  ;;  %2524 = vpow2.f32 %v2260_v3  ;;  %v2523_v11 = vpop.eup %2522  ;;  %vm1421_vm13 = vweird.f32 %v2521_v25 }
 0x1c9   : > { %v1413_v57 = vsel %vm1410_vm12, %v1412_v47, %v1408_v7  ;;  %2526 = vrcp.f32 %v1398_v6  ;;  %vm1422_vm15 = vmor %vm1420_vm14, %vm1421_vm13  ;;  %v1441_v55 = vand.u32 2147483648, %v1398_v6  ;;  %v1357_v41 = vadd.f32 %v1314_v32, %v1256_v52 }
 0x1ca   : > { %v1460_v12 = vmul.f32 %v2523_v11, %v1413_v57  ;;  %v1417_v13 = vsub.f32 1.0, %v1416_v10  ;;  %2528 = vtanh.f32 %v1368_v4  ;;  %v1439_v42 = vand.u32 2147483647, %v1398_v6 }
 0x1cb   : > { %vm1435_vm2 = vweird.f32 %v1398_v6  ;;  %v1442_v49 = vor.u32 1.1754944e-38, %v1441_v55  ;;  %v1370_v50 = vadd.f32 %v3370_v27, %v1357_v41 }
 0x1cc   : > { %v1418_v16 = vmul.f32 %v2521_v25, %v1417_v13  ;;  %vm1440_vm4 = vcmp.eq.f32.partialorder %v1439_v42, 8.507059e+37 }
 0x1ce   : > { %v2525_v20 = vpop.eup %2524  ;;  %v1419_v21 = vadd.f32 %v2521_v25, %v1418_v16 }
 0x1cf   : > { %v2527_v22 = vpop.eup %2526  ;;  %v1399_v24 = vadd.f32 1.0, %v2525_v20 }
 0x1d0   : > { %v1423_v26 = vsel %vm1422_vm15, %v2521_v25, %v1419_v21  ;;  %v1431_v28 = vmul.f32 %v2527_v22, %v1398_v6  ;;  %v2529_v33 = vpop.eup %2528  ;;  %vm1436_vm1 = vweird.f32 %v2527_v22 }
 0x1d1   : > { %v1428_v38 = vsel %vm1425_vm0, %v1427_v23, %v1423_v26  ;;  %2530 = vrcp.f32 %v1399_v24  ;;  %vm1437_vm3 = vmor %vm1435_vm2, %vm1436_vm1  ;;  %v1456_v46 = vand.u32 2147483648, %v1399_v24  ;;  %v1454_v60 = vand.u32 2147483647, %v1399_v24 }
 0x1d2   : > { %v1461_v39 = vmul.f32 %v2529_v33, %v1428_v38  ;;  %v1432_v40 = vsub.f32 1.0, %v1431_v28  ;;  %2532 = vtanh.f32 %v1369_v29  ;;  %vm1450_vm6 = vweird.f32 %v1399_v24 }
 0x1d3   : > { %2534 = vtanh.f32 %v1370_v50  ;;  %v1457_v62 = vor.u32 1.1754944e-38, %v1456_v46  ;;  %vm1455_vm9 = vcmp.eq.f32.partialorder %v1454_v60, 8.507059e+37 }
 0x1d4   : > { %v3380_v43 = vpack.c.bf16 %v1461_v39, %v1460_v12  ;;  %v1433_v31 = vmul.f32 %v2527_v22, %v1432_v40 }
 0x1d6   : > { %v1434_v30 = vadd.f32 %v2527_v22, %v1433_v31 }
 0x1d7   : > { %v2531_v45 = vpop.eup %2530 }
 0x1d8   : > { %v1438_v51 = vsel %vm1437_vm3, %v2527_v22, %v1434_v30  ;;  %v1446_v53 = vmul.f32 %v2531_v45, %v1399_v24  ;;  %v2533_v54 = vpop.eup %2532  ;;  %vm1451_vm5 = vweird.f32 %v2531_v45 }
 0x1d9   : > { %v1443_v56 = vsel %vm1440_vm4, %v1442_v49, %v1438_v51  ;;  %vm1452_vm7 = vmor %vm1450_vm6, %vm1451_vm5  ;;  %v2535_v1 = vpop.eup %2534 }
 0x1da   : > { %v1462_v44 = vmul.f32 %v2533_v54, %v1443_v56  ;;  %v1447_v58 = vsub.f32 1.0, %v1446_v53 }
 0x1dc   : > { %v1448_v59 = vmul.f32 %v2531_v45, %v1447_v58 }
 0x1de   : > { %v1449_v61 = vadd.f32 %v2531_v45, %v1448_v59 }
 0x1e0   : > { %v1453_v0 = vsel %vm1452_vm7, %v2531_v45, %v1449_v61  ;;  %1469 = sbr.rel (%p2261_p8) target bundleno = 638 (0x27e), region = 128 }
 0x1e1   : > { %v1458_v27 = vsel %vm1455_vm9, %v1457_v62, %v1453_v0 }
 0x1e2   : > { %v1463_v3 = vmul.f32 %v2535_v1, %v1458_v27 }
 0x1e4   : > { %v1465_v25 = vpack.c.bf16 %v1463_v3, %v1462_v44 }
 0x1e5   : > { %v3002_v47 = vmov 0   ;;  %v2339_v4 = vld [vmem:[%s1472_s4 + $0x8] sm:$0xff]  ;;  %v2338_v5 = vld [vmem:[%s1472_s4] sm:$0xff] }
 0x1e6   : > { %2537 = vset.pattern.permute.xlu1 %v3002_v47  ;;  %2536 = vset.pattern.permute.xlu0 %v3002_v47  ;;  %v2538_v6 = vld [vmem:[%s1477_s6] ss:$0 sm:$0xff] }
 0x1e7   : > { %1535 = vperm.xlu1 %2537, %v3284_v36   ;;  %1525 = vperm.xlu0 %2536, %v3280_v34  }
 0x1e8   : > { %1506 = vmatpush.bf16.msra.mxu0 %v2339_v4  ;;  %2351 = vmatpush.bf16.msra.mxu1 %v2339_v4 }
 0x1ec   : > { %1507 = vmatpush.bf16.msra.mxu0 %v2338_v5  ;;  %2352 = vmatpush.bf16.msra.mxu1 %v2338_v5 }
 0x1ef   : > { %1540 = vperm.xlu1 %2537, %v3286_v37   ;;  %1530 = vperm.xlu0 %2536, %v3282_v35  }
 0x1f0   : > { %2272 = vmatmul.msk.bf16.vlgmr.msra.gmra.mxu0 %vm933_vm8, %v3380_v43  ;;  %2273 = vmatmul.msk.bf16.vlgmr.msra.gmra.mxu1 %vm933_vm8, %v1465_v25 }
 0x259   : > { %v1536_v57 = vpop.permute.xlu1 %1535  ;;  %v1526_v12 = vpop.permute.xlu0 %1525 }
 0x261   : > { %v1541_v23 = vpop.permute.xlu1 %1540  ;;  %v1531_v29 = vpop.permute.xlu0 %1530 }
 0x26d   : > { %v1509_v7 = vpop.f32.mrf.mxu0  ;;  %v1514_v10 = vpop.f32.mrf.mxu1 }
 0x26e   : > { %v1510_v11 = vadd.f32 %v2538_v6, %v1509_v7  ;;  %v1515_v48 = vadd.f32 %v2538_v6, %v1514_v10 }
 0x270   : > { %v1519_v13 = vadd.f32 %v1510_v11, %v3317_v63  ;;  %v1521_v14 = vadd.f32 %v1515_v48, %v3328_v8 }
 0x272   : > { %v1543_v15 = vmul.f32 %v1526_v12, %v1519_v13  ;;  %v1545_v16 = vmul.f32 %v1536_v57, %v1521_v14 }
 0x274   : > { %1547 = vst.msk [vmem:[#allocation2 + $0x8] sm:$0xff] %vm933_vm8, %v1543_v15 }
 0x275   : > { %1549 = vst.msk [vmem:[#allocation2 + $0x28] sm:$0xff] %vm933_vm8, %v1545_v16  ;;  %v1511_v17 = vpop.f32.mrf.mxu0  ;;  %v1516_v18 = vpop.f32.mrf.mxu1 }
 0x276   : > { %v1512_v19 = vadd.f32 %v2538_v6, %v1511_v17  ;;  %v1517_v20 = vadd.f32 %v2538_v6, %v1516_v18 }
 0x278   : > { %v1520_v21 = vadd.f32 %v1512_v19, %v3319_v2  ;;  %v1522_v22 = vadd.f32 %v1517_v20, %v3330_v9 }
 0x27a   : > { %v1544_v52 = vmul.f32 %v1531_v29, %v1520_v21  ;;  %v1546_v63 = vmul.f32 %v1541_v23, %v1522_v22 }
 0x27c   : > { %1548 = vst.msk [vmem:[#allocation2 + $0x10] sm:$0xff] %vm933_vm8, %v1544_v52 }
 0x27d   : > { %1550 = vst.msk [vmem:[#allocation2 + $0x30] sm:$0xff] %vm933_vm8, %v1546_v63 }
 0x27e PF: > { %s2340_s3 = sshll.u32 %s2974_s27, 4  ;;  %s1603_s21 = scalar_lea.vmem [#allocation19], %s2974_s27  ;;  %v1551_v2 = vld [vmem:[#allocation3] sm:$0xff]  ;;  %v1553_v9 = vld [vmem:[#allocation3 + $0x10] sm:$0xff]  ;;  %v1552_v55 = vld [vmem:[#allocation3 + $0x8] sm:$0xff] }
 0x27f   : > { %s1557_s26 = scalar_lea.vmem [#allocation17], %s2340_s3  ;;  %v2539_v26 = vld [vmem:[%s1603_s21] ss:$0 sm:$0xff]  ;;  %v1554_v41 = vld [vmem:[#allocation3 + $0x18] sm:$0xff]  ;;  %p2286_p9 = scmp.ne.s32.totalorder %s2974_s27, 2 }
 0x280   : > { %v2342_v8 = vld [vmem:[%s1557_s26 + $0x8] sm:$0xff]  ;;  %v2341_v24 = vld [vmem:[%s1557_s26] sm:$0xff]  ;;  %s3542_s22 = sld [smem:[#allocation45_spill]] (!%p2286_p9) }
 0x281   : > { %1586 = vmatpush.bf16.msra.mxu0 %v2342_v8  ;;  %2353 = vmatpush.bf16.msra.mxu1 %v2342_v8 }
 0x285   : > { %1587 = vmatpush.bf16.msra.mxu0 %v2341_v24  ;;  %2354 = vmatpush.bf16.msra.mxu1 %v2341_v24 }
 0x288   : > { %2284 = vmatmul.msk.bf16.vlgmr.msra.gmra.mxu0 %vm933_vm8, %v3380_v43  ;;  %2285 = vmatmul.msk.bf16.vlgmr.msra.gmra.mxu1 %vm933_vm8, %v1465_v25 }
 0x305   : > { %v1589_v28 = vpop.f32.mrf.mxu0  ;;  %v1594_v32 = vpop.f32.mrf.mxu1 }
 0x306   : > { %v1599_v33 = vadd.f32 %v1589_v28, %v1551_v2  ;;  %v1601_v38 = vadd.f32 %v1594_v32, %v1553_v9 }
 0x308   : > { %v1608_v39 = vadd.f32 %v2539_v26, %v1599_v33  ;;  %v1610_v40 = vadd.f32 %v2539_v26, %v1601_v38 }
 0x30a   : > { %1612 = vst.msk [vmem:[#allocation3] sm:$0xff] %vm933_vm8, %v1608_v39 }
 0x30b   : > { %1614 = vst.msk [vmem:[#allocation3 + $0x10] sm:$0xff] %vm933_vm8, %v1610_v40 }
 0x30d   : > { %v1591_v31 = vpop.f32.mrf.mxu0  ;;  %v1596_v42 = vpop.f32.mrf.mxu1 }
 0x30e   : > { %v1600_v43 = vadd.f32 %v1591_v31, %v1552_v55  ;;  %v1602_v30 = vadd.f32 %v1596_v42, %v1554_v41 }
 0x30f   : > { %1619 = sbr.rel (%p2286_p9) target bundleno = 1078 (0x436), region = 132 }
 0x310   : > { %v1609_v45 = vadd.f32 %v2539_v26, %v1600_v43  ;;  %v1611_v49 = vadd.f32 %v2539_v26, %v1602_v30 }
 0x312   : > { %1613 = vst.msk [vmem:[#allocation3 + $0x8] sm:$0xff] %vm933_vm8, %v1609_v45 }
 0x313   : > { %1615 = vst.msk [vmem:[#allocation3 + $0x18] sm:$0xff] %vm933_vm8, %v1611_v49 }
 0x314   : > { %v3003_v50 = vmov 0   ;;  %v2344_v51 = vld [vmem:[#allocation20 + $0x8] sm:$0xff]  ;;  %v2346_v53 = vld [vmem:[#allocation22 + $0x8] sm:$0xff]  ;;  %v2343_v54 = vld [vmem:[#allocation20] sm:$0xff] }
 0x315   : > { %2541 = vset.pattern.permute.xlu1 %v3003_v50  ;;  %2540 = vset.pattern.permute.xlu0 %v3003_v50  ;;  %v2345_v56 = vld [vmem:[#allocation22] sm:$0xff]  ;;  %v1620_v58 = vld [vmem:[#allocation3] sm:$0xff]  ;;  %v1762_v49 = vld [vmem:[#allocation8 + $0x18] sm:$0xff] }
 0x316   : > { %1626 = vperm.xlu1 %2541, %v3280_v34   ;;  %1636 = vperm.xlu0 %2540, %v3284_v36   ;;  %v1622_v36 = vld [vmem:[#allocation3 + $0x10] sm:$0xff]  ;;  %v2542_v3 = vld [vmem:[%s3542_s22] ss:$0 sm:$0xff]  ;;  %v1743_v40 = vld [vmem:[#allocation8 + $0x8] sm:$0xff] }
 0x317   : > { %1682 = vmatpush.bf16.msra.mxu0 %v2344_v51  ;;  %2355 = vmatpush.bf16.msra.mxu2 %v2344_v51  ;;  %v2543_v25 = vld [vmem:[%s3503_s17] ss:$0 sm:$0xff]  ;;  %v1761_v32 = vld [vmem:[#allocation8 + $0x10] sm:$0xff] }
 0x318   : > { %1725 = vmatpush.bf16.msra.mxu1 %v2346_v53  ;;  %2357 = vmatpush.bf16.msra.mxu3 %v2346_v53  ;;  %v1742_v21 = vld [vmem:[#allocation8] sm:$0xff] }
 0x31a   : > { %v1623_v46 = vld [vmem:[#allocation3 + $0x18] sm:$0xff] }
 0x31b   : > { %1683 = vmatpush.bf16.msra.mxu0 %v2343_v54  ;;  %2356 = vmatpush.bf16.msra.mxu2 %v2343_v54 }
 0x31c   : > { %1726 = vmatpush.bf16.msra.mxu1 %v2345_v56  ;;  %2358 = vmatpush.bf16.msra.mxu3 %v2345_v56 }
 0x31e   : > { %1631 = vperm.xlu1 %2541, %v3282_v35   ;;  %1641 = vperm.xlu0 %2540, %v3286_v37   ;;  %v1621_v35 = vld [vmem:[#allocation3 + $0x8] sm:$0xff] }
 0x388   : > { %v1627_v44 = vpop.permute.xlu1 %1626  ;;  %v3421_v34 = vpop.permute.xlu0 %1636 }
 0x389   : > { %v1644_v60 = vmul.f32 %v1627_v44, %v1620_v58  ;;  %v1646_v62 = vmul.f32 %v3421_v34, %v1622_v36 }
 0x390   : > { %v3423_v37 = vpop.permute.xlu1 %1631  ;;  %v3425_v59 = vpop.permute.xlu0 %1641 }
 0x391   : > { %v1645_v61 = vmul.f32 %v3423_v37, %v1621_v35  ;;  %v1647_v0 = vmul.f32 %v3425_v59, %v1623_v46 }
 0x393   : > { %v1648_v1 = vpack.c.bf16 %v1645_v61, %v1644_v60  ;;  %v1649_v27 = vpack.c.bf16 %v1647_v0, %v1646_v62 }
 0x395   : > { %2295 = vmatmul.msk.bf16.vlgmr.msra.gmra.mxu0 %vm933_vm8, %v1648_v1  ;;  %2296 = vmatmul.msk.bf16.vlgmr.msra.gmra.mxu2 %vm933_vm8, %v1649_v27 }
 0x396   : > { %2305 = vmatmul.msk.bf16.vlgmr.msra.gmra.mxu1 %vm933_vm8, %v1648_v1  ;;  %2306 = vmatmul.msk.bf16.vlgmr.msra.gmra.mxu3 %vm933_vm8, %v1649_v27 }
 0x412   : > { %v1685_v47 = vpop.f32.mrf.mxu0 }
 0x413   : > { %v1686_v4 = vadd.f32 %v2542_v3, %v1685_v47  ;;  %v1728_v5 = vpop.f32.mrf.mxu1 }
 0x414   : > { %v1729_v6 = vadd.f32 %v2543_v25, %v1728_v5 }
 0x415   : > { %v1695_v7 = vmul.f32 %v1686_v4, %v1627_v44 }
 0x416   : > { %v1738_v10 = vmul.f32 %v1729_v6, %v1627_v44 }
 0x417   : > { %1756 = vst [vmem:[#allocation24] sm:$0xff] %v1695_v7 }
 0x418   : > { %v1744_v11 = vmul.f32 1.442695, %v1738_v10  ;;  %1758 = vst [vmem:[#allocation26] sm:$0xff] %v1738_v10  ;;  %v1690_v48 = vpop.f32.mrf.mxu2 }
 0x419   : > { %v1691_v57 = vadd.f32 %v2542_v3, %v1690_v48  ;;  %v1733_v12 = vpop.f32.mrf.mxu3 }
 0x41a   : > { %2544 = vpow2.f32 %v1744_v11  ;;  %v1734_v13 = vadd.f32 %v2543_v25, %v1733_v12  ;;  %v1687_v14 = vpop.f32.mrf.mxu0 }
 0x41b   : > { %v1697_v15 = vmul.f32 %v1691_v57, %v3421_v34  ;;  %v1688_v16 = vadd.f32 %v2542_v3, %v1687_v14  ;;  %v1730_v17 = vpop.f32.mrf.mxu1 }
 0x41c   : > { %v1740_v18 = vmul.f32 %v1734_v13, %v3421_v34  ;;  %v1731_v19 = vadd.f32 %v2543_v25, %v1730_v17 }
 0x41d   : > { %1777 = vst [vmem:[#allocation24 + $0x10] sm:$0xff] %v1697_v15  ;;  %v1696_v20 = vmul.f32 %v1688_v16, %v3423_v37 }
 0x41e   : > { %v1763_v22 = vmul.f32 1.442695, %v1740_v18  ;;  %1780 = vst [vmem:[#allocation26 + $0x10] sm:$0xff] %v1740_v18  ;;  %v1739_v23 = vmul.f32 %v1731_v19, %v3423_v37 }
 0x41f   : > { %1757 = vst [vmem:[#allocation24 + $0x8] sm:$0xff] %v1696_v20 }
 0x420   : > { %v2545_v29 = vpop.eup %2544  ;;  %2546 = vpow2.f32 %v1763_v22  ;;  %v1746_v52 = vmul.f32 1.442695, %v1739_v23  ;;  %1759 = vst [vmem:[#allocation26 + $0x8] sm:$0xff] %v1739_v23  ;;  %v1692_v63 = vpop.f32.mrf.mxu2 }
 0x421   : > { %v1748_v8 = vmul.f32 %v2545_v29, %v1742_v21  ;;  %v1693_v24 = vadd.f32 %v2542_v3, %v1692_v63  ;;  %v1735_v2 = vpop.f32.mrf.mxu3 }
 0x422   : > { %2548 = vpow2.f32 %v1746_v52  ;;  %v1736_v9 = vadd.f32 %v2543_v25, %v1735_v2 }
 0x423   : > { %v1750_v26 = vadd.f32 %v1748_v8, %v1695_v7  ;;  %v1698_v28 = vmul.f32 %v1693_v24, %v3425_v59 }
 0x424   : > { %v1741_v33 = vmul.f32 %v1736_v9, %v3425_v59 }
 0x425   : > { %v1752_v38 = vmul.f32 %v1750_v26, %v1627_v44  ;;  %1778 = vst [vmem:[#allocation24 + $0x18] sm:$0xff] %v1698_v28 }
 0x426   : > { %v2547_v39 = vpop.eup %2546  ;;  %v1765_v55 = vmul.f32 1.442695, %v1741_v33  ;;  %1781 = vst [vmem:[#allocation26 + $0x18] sm:$0xff] %v1741_v33 }
 0x427   : > { %1754 = vst [vmem:[#allocation23] sm:$0xff] %v1752_v38  ;;  %v1767_v41 = vmul.f32 %v2547_v39, %v1761_v32 }
 0x428   : > { %v2549_v31 = vpop.eup %2548  ;;  %2550 = vpow2.f32 %v1765_v55 }
 0x429   : > { %v1769_v42 = vadd.f32 %v1767_v41, %v1697_v15  ;;  %v1749_v43 = vmul.f32 %v2549_v31, %v1743_v40 }
 0x42b   : > { %v1771_v30 = vmul.f32 %v1769_v42, %v3421_v34  ;;  %v1751_v45 = vadd.f32 %v1749_v43, %v1696_v20 }
 0x42d   : > { %1774 = vst [vmem:[#allocation23 + $0x10] sm:$0xff] %v1771_v30  ;;  %v1753_v50 = vmul.f32 %v1751_v45, %v3423_v37 }
 0x42e   : > { %v2551_v51 = vpop.eup %2550 }
 0x42f   : > { %1755 = vst [vmem:[#allocation23 + $0x8] sm:$0xff] %v1753_v50  ;;  %v1768_v53 = vmul.f32 %v2551_v51, %v1762_v49 }
 0x431   : > { %v1770_v54 = vadd.f32 %v1768_v53, %v1698_v28 }
 0x433   : > { %v1772_v56 = vmul.f32 %v1770_v54, %v3425_v59 }
 0x435   : > { %1775 = vst [vmem:[#allocation23 + $0x18] sm:$0xff] %v1772_v56 }
 0x436 PF: > { %s3543_s5 = sadd.s32 4294967295, %s2982_s1   ;;  %s3004_s15 = smov [#allocation24]  }
 0x437   : > { %p3451_p10 = scmp.eq.s32.totalorder %s3543_s5, 2  ;;  %s1809_s23 = sshll.u32 %s3004_s15, 4  ;;  %s1810_s23 = int_to_ptr.vmem [resolvable:$true] %s1809_s23 }
 0x438   : > { %s1811_s6 = sshll.u32 %s3505_s19, 4  ;;  %s3005_s9 = smov 128   ;;  %s1812_s6 = int_to_ptr.hbm [resolvable:$true] %s1811_s6 }
 0x439   : > { %s3006_s2 = smov 8   ;;  %s3007_s4 = smov [#allocation23]  }
 0x43a   : > { %2398 = dma.vmem_to_hbm [thread:$0]  (%p3451_p10), %s1810_s23, 512, %s1812_s6, [#allocation25], %s3005_s9, %s3005_s9, %s3006_s2  }
 0x43b   : > { %s1791_s3 = sshll.u32 %s3007_s4, 4  ;;  %s1793_s27 = sshll.u32 %s3504_s18, 4  ;;  %s1792_s3 = int_to_ptr.vmem [resolvable:$true] %s1791_s3  ;;  %s1794_s27 = int_to_ptr.hbm [resolvable:$true] %s1793_s27 }
 0x43c   : > { %2396 = dma.vmem_to_hbm [thread:$0]  (%p3451_p10), %s1792_s3, 512, %s1794_s27, [#allocation10], %s3005_s9, %s3005_s9, %s3006_s2  }
 0x43d   : > { %s3545_s24 = sld [smem:[#allocation46_spill]]  ;;  %s3008_s5 = smov [#allocation26]  }
 0x43e   : > { %s1827_s15 = sshll.u32 %s3008_s5, 4  ;;  %s1828_s15 = int_to_ptr.vmem [resolvable:$true] %s1827_s15 }
 0x443   : > { %s1829_s30 = sshll.u32 %s3545_s24, 4  ;;  %s1830_s30 = int_to_ptr.hbm [resolvable:$true] %s1829_s30 }
 0x444   : > { %2400 = dma.vmem_to_hbm [thread:$0]  (%p3451_p10), %s1828_s15, 512, %s1830_s30, [#allocation25], %s3005_s9, %s3005_s9, %s3006_s2  }
 0x445   : > { %2965 = dma.done.wait (%p3451_p10), [#allocation10], 512  }
 0x446   : > { %2967 = vsyncadd (%p3451_p10), [#allocation10], 4294966784 }
 0x447   : > { %2969 = dma.done.wait (%p3451_p10), [#allocation25], 1024  }
 0x448   : > { %2971 = vsyncadd (%p3451_p10), [#allocation25], 4294966272 }
 0x449 PF: > { %s51_s1 = sadd.s32 1, %s2982_s1   ;;  %s3546_s27 = smov %s2978_s28 }
 0x44a   : > { %p48_p11 = scmp.ge.s32.totalorder %s51_s1, 5   ;;  %s3547_s28 = smov %s3549_s0 }
 0x44c   :  { %50 = sbr.rel (!%p48_p11) target bundleno = 33 (0x21), region = 211 }
 0x451   :  { %1856 = vsyncpa [#allocation9], 1 }
 0x452   :  { %1858 = vsyncpa [#allocation9 + $0x1], 1 }
 0x453   :  { %1859 = vsyncpa [#allocation12], 1 }
 0x454   :  { %1860 = vsyncpa [#allocation15], 1 }
 0x455   :  { %1861 = vsyncpa [#allocation18], 1 }
 0x456   :  { %1862 = vsyncpa [#allocation21], 1 }
 0x457   :  { %1863 = vsyncpa [#allocation10], 1 }
 0x458   :  { %1865 = vsyncpa [#allocation10 + $0x1], 1 }
 0x459   :  { %1866 = vsyncpa [#allocation25], 1 }

</bundles_post_ra>
